<compile_context>
chip_gen: v5e
topology: v5e:2x2
jax: 0.10.0
libtpu: 0.0.40
codegen_flags: <defaults>
</compile_context>

<pallas_src>
import functools
import math

import jax
import jax.numpy as jnp
from jax import lax
from jax.experimental import pallas as pl
from jax.experimental.pallas import tpu as pltpu

LANE = 128


def _round_up(n, m):
    return ((n + m - 1) // m) * m


# ----------------------------- Pallas kernel --------------------------------
def gru_head_kernel(x_ref, wih_ref, whh_ref, b_ref, wfc_ref, bfc_ref,
                    out_ref, gx_sc, h_all_sc, *, seq_len, batch):
    """Single-layer GRU + linear head, whole sequence in one invocation.

    x_ref    : (T*B, I)    time-major flattened input
    wih_ref  : (I, 3*Hp)   masked input->hidden weights, gate g at cols [g*Hp, g*Hp+H)
    whh_ref  : (Hp, 3*Hp)  masked hidden->hidden weights (same lane-aligned gate layout)
    b_ref    : (2, 3*Hp)   row 0 = b_ih, row 1 = b_hh (gate lane-aligned, zero padded)
    wfc_ref  : (Hp, Op)    masked fc weights (zero-padded rows/cols)
    bfc_ref  : (1, Op)     fc bias (zero-padded)
    out_ref  : (T*B, Op)   lane-dense per-timestep outputs
    gx_sc    : (T*B, 3*Hp) VMEM scratch: precomputed input projections
    h_all_sc : (T*B, Hp)   VMEM scratch: all hidden states
    """
    Hp = whh_ref.shape[0]                      # lane-padded hidden (multiple of 128)

    # ---- hoisted input projection for all timesteps (off the critical path) ----
    gx_sc[...] = (jnp.dot(x_ref[...], wih_ref[...],
                          preferred_element_type=jnp.float32)
                  + b_ref[0:1, :])

    # ---- hoisted loop invariants ----
    whh = whh_ref[...]                         # (Hp, 3Hp)
    b_hh = b_ref[1:2, :]                       # (1, 3Hp)

    def step(t, h_prev):
        row = pl.multiple_of(t * batch, batch)             # sublane-aligned start
        gx = gx_sc[pl.ds(row, batch), :]                   # (B, 3Hp)
        gh = jnp.dot(h_prev, whh,
                     preferred_element_type=jnp.float32) + b_hh   # (B, 3Hp)
        # lane-aligned per-gate slices: each gate occupies its own 128-lane block
        r = jax.nn.sigmoid(gx[:, 0:Hp] + gh[:, 0:Hp])
        z = jax.nn.sigmoid(gx[:, Hp:2 * Hp] + gh[:, Hp:2 * Hp])
        n = jnp.tanh(gx[:, 2 * Hp:3 * Hp] + r * gh[:, 2 * Hp:3 * Hp])
        h = (1.0 - z) * n + z * h_prev
        h_all_sc[pl.ds(row, batch), :] = h
        return h

    h0 = jnp.zeros((batch, Hp), jnp.float32)
    lax.fori_loop(0, seq_len, step, h0, unroll=True)

    # ---- hoisted fc head: one matmul + one dense lane-aligned store ----
    out_ref[...] = (jnp.dot(h_all_sc[...], wfc_ref[...],
                            preferred_element_type=jnp.float32)
                    + bfc_ref[...]).astype(out_ref.dtype)


# ------------------------------ wrapper --------------------------------------
def modified_rnn_forward(x_btf, wih, whh, b_stack, wfc, bfc):
    """x_btf: (B, T, I) batch_first input -> (B, T, O) output."""
    B, T, I = x_btf.shape
    H = whh.shape[0]
    O = wfc.shape[1]
    Hp = _round_up(H, LANE)
    Op = _round_up(O, LANE)

    # ---- wrapper-side layout plumbing: lane-align gates / output (zero padding) ----
    def pad_gate_cols(w):   # (R, 3H) -> (R, 3*Hp), gate g at cols [g*Hp, g*Hp+H)
        R = w.shape[0]
        return jnp.pad(w.reshape(R, 3, H),
                       ((0, 0), (0, 0), (0, Hp - H))).reshape(R, 3 * Hp)

    wih_p = pad_gate_cols(wih)                                    # (I, 3Hp)
    whh_p = jnp.pad(pad_gate_cols(whh), ((0, Hp - H), (0, 0)))    # (Hp, 3Hp)
    b_p = pad_gate_cols(b_stack)                                  # (2, 3Hp)
    wfc_p = jnp.pad(wfc, ((0, Hp - H), (0, Op - O)))              # (Hp, Op)
    bfc_p = jnp.pad(bfc, ((0, 0), (0, Op - O)))                   # (1, Op)

    x2d = jnp.transpose(x_btf, (1, 0, 2)).reshape(T * B, I)       # time-major, flat

    kernel = functools.partial(gru_head_kernel, seq_len=T, batch=B)

    out2d = pl.pallas_call(
        kernel,
        out_shape=jax.ShapeDtypeStruct((T * B, Op), jnp.float32),
        grid=(1,),
        in_specs=[
            pl.BlockSpec((T * B, I), lambda i: (0, 0)),
            pl.BlockSpec((I, 3 * Hp), lambda i: (0, 0)),
            pl.BlockSpec((Hp, 3 * Hp), lambda i: (0, 0)),
            pl.BlockSpec((2, 3 * Hp), lambda i: (0, 0)),
            pl.BlockSpec((Hp, Op), lambda i: (0, 0)),
            pl.BlockSpec((1, Op), lambda i: (0, 0)),
        ],
        out_specs=pl.BlockSpec((T * B, Op), lambda i: (0, 0)),
        scratch_shapes=[
            pltpu.VMEM((T * B, 3 * Hp), jnp.float32),
            pltpu.VMEM((T * B, Hp), jnp.float32),
        ],
        compiler_params=pltpu.CompilerParams(
            dimension_semantics=("arbitrary",)),
    )(x2d, wih_p, whh_p, b_p, wfc_p, bfc_p)

    out_tbo = out2d[:, :O].reshape(T, B, O)
    return jnp.transpose(out_tbo, (1, 0, 2))


# -------------------- deterministic parameter construction -------------------
def binarize(mask_real, threshold):
    return (mask_real > threshold).astype(jnp.float32)


def make_params(key, input_size, hidden_size, output_size,
                mask_scale=1e-2, threshold=None):
    """Pretrained GRU/fc weights (PyTorch-style init) + piggyback masks."""
    if threshold is None:
        threshold = mask_scale / 2.0
    k = 1.0 / math.sqrt(hidden_size)
    keys = jax.random.split(key, 10)

    # pretrained weights, stored transposed (right-multiply), gate order r,z,n
    w_ih = jax.random.uniform(keys[0], (input_size, 3 * hidden_size),
                              jnp.float32, -k, k)
    w_hh = jax.random.uniform(keys[1], (hidden_size, 3 * hidden_size),
                              jnp.float32, -k, k)
    b_ih = jax.random.uniform(keys[2], (3 * hidden_size,), jnp.float32, -k, k)
    b_hh = jax.random.uniform(keys[3], (3 * hidden_size,), jnp.float32, -k, k)
    w_fc = jax.random.uniform(keys[4], (hidden_size, output_size),
                              jnp.float32, -k, k)
    b_fc = jax.random.uniform(keys[5], (output_size,), jnp.float32, -k, k)

    # piggyback real-valued masks (mask_init='uniform', mask_scale) + binarizer
    m_ih = binarize(jax.random.uniform(keys[6], w_ih.shape, jnp.float32,
                                       0.0, mask_scale), threshold)
    m_hh = binarize(jax.random.uniform(keys[7], w_hh.shape, jnp.float32,
                                       0.0, mask_scale), threshold)
    m_fc = binarize(jax.random.uniform(keys[8], w_fc.shape, jnp.float32,
                                       0.0, mask_scale), threshold)

    wih_eff = w_ih * m_ih
    whh_eff = w_hh * m_hh
    wfc_eff = w_fc * m_fc
    b_stack = jnp.stack([b_ih, b_hh], axis=0)        # (2, 3H)
    bfc = b_fc.reshape(1, output_size)               # (1, O)
    return wih_eff, whh_eff, b_stack, wfc_eff, bfc


# ------------------------- pure-JAX reference --------------------------------
def reference_forward(x_btf, wih, whh, b_stack, wfc, bfc):
    B, T, I = x_btf.shape
    H = whh.shape[0]
    b_ih, b_hh = b_stack[0], b_stack[1]

    def cell(h, x_t):
        gx = x_t @ wih + b_ih
        gh = h @ whh + b_hh
        r = jax.nn.sigmoid(gx[:, :H] + gh[:, :H])
        z = jax.nn.sigmoid(gx[:, H:2 * H] + gh[:, H:2 * H])
        n = jnp.tanh(gx[:, 2 * H:] + r * gh[:, 2 * H:])
        h_new = (1.0 - z) * n + z * h
        return h_new, h_new @ wfc + bfc[0]

    h0 = jnp.zeros((B, H), jnp.float32)
    _, ys = lax.scan(cell, h0, jnp.transpose(x_btf, (1, 0, 2)))
    return jnp.transpose(ys, (1, 0, 2))


# --------------------------------- main ---------------------------------------
if __name__ == "__main__":
    # small shapes consistent with the module (input_size, hidden_size, output_size, seq_len)
    B, T, I, H, O = 8, 8, 4, 32, 4

    key = jax.random.PRNGKey(0)
    k_x, k_p = jax.random.split(key)
    x = jax.random.normal(k_x, (B, T, I), jnp.float32)

    wih, whh, b_stack, wfc, bfc = make_params(k_p, I, H, O)

    out = modified_rnn_forward(x, wih, whh, b_stack, wfc, bfc)
    out = jax.block_until_ready(out)

    ref = reference_forward(x, wih, whh, b_stack, wfc, bfc)
    assert out.shape == (B, T, O)
    assert bool(jnp.allclose(out, ref, atol=1e-5, rtol=1e-5))

    print("KERNEL_OK")
</pallas_src>

<mosaic_0001>
module attributes {stable_mosaic.version = 11 : i64} {
  func.func @gru_head_kernel(%arg0: i32, %arg1: memref<64x4xf32, #tpu.memory_space<vmem>>, %arg2: memref<4x384xf32, #tpu.memory_space<vmem>>, %arg3: memref<128x384xf32, #tpu.memory_space<vmem>>, %arg4: memref<2x384xf32, #tpu.memory_space<vmem>>, %arg5: memref<128x128xf32, #tpu.memory_space<vmem>>, %arg6: memref<1x128xf32, #tpu.memory_space<vmem>>, %arg7: memref<64x128xf32, #tpu.memory_space<vmem>>, %arg8: memref<64x384xf32, #tpu.memory_space<vmem>>, %arg9: memref<64x128xf32, #tpu.memory_space<vmem>>) attributes {dimension_semantics = [#tpu.dimension_semantics<arbitrary>], iteration_bounds = array<i64: 1>, scalar_prefetch = 0 : i64, scratch_operands = 2 : i64, tpu.core_type = #tpu.core_type<tc>, window_params = [{pipeline_mode = #tpu.pipeline_mode<synchronous>, transform_indices = @transform_0, window_bounds = array<i64: 64, 4>}, {pipeline_mode = #tpu.pipeline_mode<synchronous>, transform_indices = @transform_1, window_bounds = array<i64: 4, 384>}, {pipeline_mode = #tpu.pipeline_mode<synchronous>, transform_indices = @transform_2, window_bounds = array<i64: 128, 384>}, {pipeline_mode = #tpu.pipeline_mode<synchronous>, transform_indices = @transform_3, window_bounds = array<i64: 2, 384>}, {pipeline_mode = #tpu.pipeline_mode<synchronous>, transform_indices = @transform_4, window_bounds = array<i64: 128, 128>}, {pipeline_mode = #tpu.pipeline_mode<synchronous>, transform_indices = @transform_5, window_bounds = array<i64: 1, 128>}, {pipeline_mode = #tpu.pipeline_mode<synchronous>, transform_indices = @transform_6, window_bounds = array<i64: 64, 128>}]} {
    %c0 = arith.constant 0 : index
    %c0_0 = arith.constant 0 : index
    %0 = vector.load %arg1[%c0, %c0_0] : memref<64x4xf32, #tpu.memory_space<vmem>>, vector<64x4xf32>
    %c0_1 = arith.constant 0 : index
    %c0_2 = arith.constant 0 : index
    %1 = vector.load %arg2[%c0_1, %c0_2] : memref<4x384xf32, #tpu.memory_space<vmem>>, vector<4x384xf32>
    %cst = arith.constant dense<0.000000e+00> : vector<64x384xf32>
    %2 = tpu.matmul %0, %1, %cst {dimension_numbers = #tpu.dot_dimension_numbers<[1], [0], [0], [1], [0, 0, 1, 1], [], []>} : vector<64x4xf32>, vector<4x384xf32>, vector<64x384xf32> -> vector<64x384xf32>
    %c0_3 = arith.constant 0 : index
    %c0_4 = arith.constant 0 : index
    %3 = vector.load %arg4[%c0_3, %c0_4] : memref<2x384xf32, #tpu.memory_space<vmem>>, vector<1x384xf32>
    %4 = vector.broadcast %3 : vector<1x384xf32> to vector<64x384xf32>
    %5 = arith.addf %2, %4 : vector<64x384xf32>
    %c0_5 = arith.constant 0 : index
    %c0_6 = arith.constant 0 : index
    %6 = vector.load %arg8[%c0_5, %c0_6] : memref<64x384xf32, #tpu.memory_space<vmem>>, vector<64x384xf32>
    tpu.vector_store %arg8[%c0_5, %c0_6], %5 {strides = array<i32>} : memref<64x384xf32, #tpu.memory_space<vmem>>, vector<64x384xf32>,
    %c0_7 = arith.constant 0 : index
    %c0_8 = arith.constant 0 : index
    %7 = vector.load %arg3[%c0_7, %c0_8] : memref<128x384xf32, #tpu.memory_space<vmem>>, vector<128x384xf32>
    %c1 = arith.constant 1 : index
    %c0_9 = arith.constant 0 : index
    %8 = vector.load %arg4[%c1, %c0_9] : memref<2x384xf32, #tpu.memory_space<vmem>>, vector<1x384xf32>
    %cst_10 = arith.constant 0.000000e+00 : f32
    %9 = vector.broadcast %cst_10 : f32 to vector<8x128xf32>
    %c0_i32 = arith.constant 0 : i32
    %c8_i32 = arith.constant 8 : i32
    %10 = arith.muli %c0_i32, %c8_i32 : i32
    %11 = tpu.assume_multiple %10, 8 : i32
    %12 = arith.index_cast %11 : i32 to index
    %c0_11 = arith.constant 0 : index
    %13 = vector.load %arg8[%12, %c0_11] : memref<64x384xf32, #tpu.memory_space<vmem>>, vector<8x384xf32>
    %cst_12 = arith.constant dense<0.000000e+00> : vector<8x384xf32>
    %14 = tpu.matmul %9, %7, %cst_12 {dimension_numbers = #tpu.dot_dimension_numbers<[1], [0], [0], [1], [0, 0, 1, 1], [], []>} : vector<8x128xf32>, vector<128x384xf32>, vector<8x384xf32> -> vector<8x384xf32>
    %15 = vector.broadcast %8 : vector<1x384xf32> to vector<8x384xf32>
    %16 = arith.addf %14, %15 : vector<8x384xf32>
    %17 = vector.extract_strided_slice %13 {offsets = [0, 0], sizes = [8, 128], strides = [1, 1]} : vector<8x384xf32> to vector<8x128xf32>
    %18 = vector.extract_strided_slice %16 {offsets = [0, 0], sizes = [8, 128], strides = [1, 1]} : vector<8x384xf32> to vector<8x128xf32>
    %19 = arith.addf %17, %18 : vector<8x128xf32>
    %20 = arith.negf %19 : vector<8x128xf32>
    %21 = math.exp %20 : vector<8x128xf32>
    %cst_13 = arith.constant 1.000000e+00 : f32
    %22 = vector.broadcast %cst_13 : f32 to vector<8x128xf32>
    %23 = arith.addf %22, %21 : vector<8x128xf32>
    %24 = arith.divf %22, %23 : vector<8x128xf32>
    %25 = vector.extract_strided_slice %13 {offsets = [0, 128], sizes = [8, 128], strides = [1, 1]} : vector<8x384xf32> to vector<8x128xf32>
    %26 = vector.extract_strided_slice %16 {offsets = [0, 128], sizes = [8, 128], strides = [1, 1]} : vector<8x384xf32> to vector<8x128xf32>
    %27 = arith.addf %25, %26 : vector<8x128xf32>
    %28 = arith.negf %27 : vector<8x128xf32>
    %29 = math.exp %28 : vector<8x128xf32>
    %cst_14 = arith.constant 1.000000e+00 : f32
    %30 = vector.broadcast %cst_14 : f32 to vector<8x128xf32>
    %31 = arith.addf %30, %29 : vector<8x128xf32>
    %32 = arith.divf %30, %31 : vector<8x128xf32>
    %33 = vector.extract_strided_slice %13 {offsets = [0, 256], sizes = [8, 128], strides = [1, 1]} : vector<8x384xf32> to vector<8x128xf32>
    %34 = vector.extract_strided_slice %16 {offsets = [0, 256], sizes = [8, 128], strides = [1, 1]} : vector<8x384xf32> to vector<8x128xf32>
    %35 = arith.mulf %24, %34 : vector<8x128xf32>
    %36 = arith.addf %33, %35 : vector<8x128xf32>
    %37 = math.tanh %36 : vector<8x128xf32>
    %cst_15 = arith.constant 1.000000e+00 : f32
    %38 = vector.broadcast %cst_15 : f32 to vector<8x128xf32>
    %39 = arith.subf %38, %32 : vector<8x128xf32>
    %40 = arith.mulf %39, %37 : vector<8x128xf32>
    %41 = arith.mulf %32, %9 : vector<8x128xf32>
    %42 = arith.addf %40, %41 : vector<8x128xf32>
    %43 = arith.index_cast %11 : i32 to index
    %c0_16 = arith.constant 0 : index
    %44 = vector.load %arg9[%43, %c0_16] : memref<64x128xf32, #tpu.memory_space<vmem>>, vector<8x128xf32>
    tpu.vector_store %arg9[%43, %c0_16], %42 {strides = array<i32>} : memref<64x128xf32, #tpu.memory_space<vmem>>, vector<8x128xf32>,
    %c1_i32 = arith.constant 1 : i32
    %c8_i32_17 = arith.constant 8 : i32
    %45 = arith.muli %c1_i32, %c8_i32_17 : i32
    %46 = tpu.assume_multiple %45, 8 : i32
    %47 = arith.index_cast %46 : i32 to index
    %c0_18 = arith.constant 0 : index
    %48 = vector.load %arg8[%47, %c0_18] : memref<64x384xf32, #tpu.memory_space<vmem>>, vector<8x384xf32>
    %cst_19 = arith.constant dense<0.000000e+00> : vector<8x384xf32>
    %49 = tpu.matmul %42, %7, %cst_19 {dimension_numbers = #tpu.dot_dimension_numbers<[1], [0], [0], [1], [0, 0, 1, 1], [], []>} : vector<8x128xf32>, vector<128x384xf32>, vector<8x384xf32> -> vector<8x384xf32>
    %50 = vector.broadcast %8 : vector<1x384xf32> to vector<8x384xf32>
    %51 = arith.addf %49, %50 : vector<8x384xf32>
    %52 = vector.extract_strided_slice %48 {offsets = [0, 0], sizes = [8, 128], strides = [1, 1]} : vector<8x384xf32> to vector<8x128xf32>
    %53 = vector.extract_strided_slice %51 {offsets = [0, 0], sizes = [8, 128], strides = [1, 1]} : vector<8x384xf32> to vector<8x128xf32>
    %54 = arith.addf %52, %53 : vector<8x128xf32>
    %55 = arith.negf %54 : vector<8x128xf32>
    %56 = math.exp %55 : vector<8x128xf32>
    %cst_20 = arith.constant 1.000000e+00 : f32
    %57 = vector.broadcast %cst_20 : f32 to vector<8x128xf32>
    %58 = arith.addf %57, %56 : vector<8x128xf32>
    %59 = arith.divf %57, %58 : vector<8x128xf32>
    %60 = vector.extract_strided_slice %48 {offsets = [0, 128], sizes = [8, 128], strides = [1, 1]} : vector<8x384xf32> to vector<8x128xf32>
    %61 = vector.extract_strided_slice %51 {offsets = [0, 128], sizes = [8, 128], strides = [1, 1]} : vector<8x384xf32> to vector<8x128xf32>
    %62 = arith.addf %60, %61 : vector<8x128xf32>
    %63 = arith.negf %62 : vector<8x128xf32>
    %64 = math.exp %63 : vector<8x128xf32>
    %cst_21 = arith.constant 1.000000e+00 : f32
    %65 = vector.broadcast %cst_21 : f32 to vector<8x128xf32>
    %66 = arith.addf %65, %64 : vector<8x128xf32>
    %67 = arith.divf %65, %66 : vector<8x128xf32>
    %68 = vector.extract_strided_slice %48 {offsets = [0, 256], sizes = [8, 128], strides = [1, 1]} : vector<8x384xf32> to vector<8x128xf32>
    %69 = vector.extract_strided_slice %51 {offsets = [0, 256], sizes = [8, 128], strides = [1, 1]} : vector<8x384xf32> to vector<8x128xf32>
    %70 = arith.mulf %59, %69 : vector<8x128xf32>
    %71 = arith.addf %68, %70 : vector<8x128xf32>
    %72 = math.tanh %71 : vector<8x128xf32>
    %cst_22 = arith.constant 1.000000e+00 : f32
    %73 = vector.broadcast %cst_22 : f32 to vector<8x128xf32>
    %74 = arith.subf %73, %67 : vector<8x128xf32>
    %75 = arith.mulf %74, %72 : vector<8x128xf32>
    %76 = arith.mulf %67, %42 : vector<8x128xf32>
    %77 = arith.addf %75, %76 : vector<8x128xf32>
    %78 = arith.index_cast %46 : i32 to index
    %c0_23 = arith.constant 0 : index
    %79 = vector.load %arg9[%78, %c0_23] : memref<64x128xf32, #tpu.memory_space<vmem>>, vector<8x128xf32>
    tpu.vector_store %arg9[%78, %c0_23], %77 {strides = array<i32>} : memref<64x128xf32, #tpu.memory_space<vmem>>, vector<8x128xf32>,
    %c2_i32 = arith.constant 2 : i32
    %c8_i32_24 = arith.constant 8 : i32
    %80 = arith.muli %c2_i32, %c8_i32_24 : i32
    %81 = tpu.assume_multiple %80, 8 : i32
    %82 = arith.index_cast %81 : i32 to index
    %c0_25 = arith.constant 0 : index
    %83 = vector.load %arg8[%82, %c0_25] : memref<64x384xf32, #tpu.memory_space<vmem>>, vector<8x384xf32>
    %cst_26 = arith.constant dense<0.000000e+00> : vector<8x384xf32>
    %84 = tpu.matmul %77, %7, %cst_26 {dimension_numbers = #tpu.dot_dimension_numbers<[1], [0], [0], [1], [0, 0, 1, 1], [], []>} : vector<8x128xf32>, vector<128x384xf32>, vector<8x384xf32> -> vector<8x384xf32>
    %85 = vector.broadcast %8 : vector<1x384xf32> to vector<8x384xf32>
    %86 = arith.addf %84, %85 : vector<8x384xf32>
    %87 = vector.extract_strided_slice %83 {offsets = [0, 0], sizes = [8, 128], strides = [1, 1]} : vector<8x384xf32> to vector<8x128xf32>
    %88 = vector.extract_strided_slice %86 {offsets = [0, 0], sizes = [8, 128], strides = [1, 1]} : vector<8x384xf32> to vector<8x128xf32>
    %89 = arith.addf %87, %88 : vector<8x128xf32>
    %90 = arith.negf %89 : vector<8x128xf32>
    %91 = math.exp %90 : vector<8x128xf32>
    %cst_27 = arith.constant 1.000000e+00 : f32
    %92 = vector.broadcast %cst_27 : f32 to vector<8x128xf32>
    %93 = arith.addf %92, %91 : vector<8x128xf32>
    %94 = arith.divf %92, %93 : vector<8x128xf32>
    %95 = vector.extract_strided_slice %83 {offsets = [0, 128], sizes = [8, 128], strides = [1, 1]} : vector<8x384xf32> to vector<8x128xf32>
    %96 = vector.extract_strided_slice %86 {offsets = [0, 128], sizes = [8, 128], strides = [1, 1]} : vector<8x384xf32> to vector<8x128xf32>
    %97 = arith.addf %95, %96 : vector<8x128xf32>
    %98 = arith.negf %97 : vector<8x128xf32>
    %99 = math.exp %98 : vector<8x128xf32>
    %cst_28 = arith.constant 1.000000e+00 : f32
    %100 = vector.broadcast %cst_28 : f32 to vector<8x128xf32>
    %101 = arith.addf %100, %99 : vector<8x128xf32>
    %102 = arith.divf %100, %101 : vector<8x128xf32>
    %103 = vector.extract_strided_slice %83 {offsets = [0, 256], sizes = [8, 128], strides = [1, 1]} : vector<8x384xf32> to vector<8x128xf32>
    %104 = vector.extract_strided_slice %86 {offsets = [0, 256], sizes = [8, 128], strides = [1, 1]} : vector<8x384xf32> to vector<8x128xf32>
    %105 = arith.mulf %94, %104 : vector<8x128xf32>
    %106 = arith.addf %103, %105 : vector<8x128xf32>
    %107 = math.tanh %106 : vector<8x128xf32>
    %cst_29 = arith.constant 1.000000e+00 : f32
    %108 = vector.broadcast %cst_29 : f32 to vector<8x128xf32>
    %109 = arith.subf %108, %102 : vector<8x128xf32>
    %110 = arith.mulf %109, %107 : vector<8x128xf32>
    %111 = arith.mulf %102, %77 : vector<8x128xf32>
    %112 = arith.addf %110, %111 : vector<8x128xf32>
    %113 = arith.index_cast %81 : i32 to index
    %c0_30 = arith.constant 0 : index
    %114 = vector.load %arg9[%113, %c0_30] : memref<64x128xf32, #tpu.memory_space<vmem>>, vector<8x128xf32>
    tpu.vector_store %arg9[%113, %c0_30], %112 {strides = array<i32>} : memref<64x128xf32, #tpu.memory_space<vmem>>, vector<8x128xf32>,
    %c3_i32 = arith.constant 3 : i32
    %c8_i32_31 = arith.constant 8 : i32
    %115 = arith.muli %c3_i32, %c8_i32_31 : i32
    %116 = tpu.assume_multiple %115, 8 : i32
    %117 = arith.index_cast %116 : i32 to index
    %c0_32 = arith.constant 0 : index
    %118 = vector.load %arg8[%117, %c0_32] : memref<64x384xf32, #tpu.memory_space<vmem>>, vector<8x384xf32>
    %cst_33 = arith.constant dense<0.000000e+00> : vector<8x384xf32>
    %119 = tpu.matmul %112, %7, %cst_33 {dimension_numbers = #tpu.dot_dimension_numbers<[1], [0], [0], [1], [0, 0, 1, 1], [], []>} : vector<8x128xf32>, vector<128x384xf32>, vector<8x384xf32> -> vector<8x384xf32>
    %120 = vector.broadcast %8 : vector<1x384xf32> to vector<8x384xf32>
    %121 = arith.addf %119, %120 : vector<8x384xf32>
    %122 = vector.extract_strided_slice %118 {offsets = [0, 0], sizes = [8, 128], strides = [1, 1]} : vector<8x384xf32> to vector<8x128xf32>
    %123 = vector.extract_strided_slice %121 {offsets = [0, 0], sizes = [8, 128], strides = [1, 1]} : vector<8x384xf32> to vector<8x128xf32>
    %124 = arith.addf %122, %123 : vector<8x128xf32>
    %125 = arith.negf %124 : vector<8x128xf32>
    %126 = math.exp %125 : vector<8x128xf32>
    %cst_34 = arith.constant 1.000000e+00 : f32
    %127 = vector.broadcast %cst_34 : f32 to vector<8x128xf32>
    %128 = arith.addf %127, %126 : vector<8x128xf32>
    %129 = arith.divf %127, %128 : vector<8x128xf32>
    %130 = vector.extract_strided_slice %118 {offsets = [0, 128], sizes = [8, 128], strides = [1, 1]} : vector<8x384xf32> to vector<8x128xf32>
    %131 = vector.extract_strided_slice %121 {offsets = [0, 128], sizes = [8, 128], strides = [1, 1]} : vector<8x384xf32> to vector<8x128xf32>
    %132 = arith.addf %130, %131 : vector<8x128xf32>
    %133 = arith.negf %132 : vector<8x128xf32>
    %134 = math.exp %133 : vector<8x128xf32>
    %cst_35 = arith.constant 1.000000e+00 : f32
    %135 = vector.broadcast %cst_35 : f32 to vector<8x128xf32>
    %136 = arith.addf %135, %134 : vector<8x128xf32>
    %137 = arith.divf %135, %136 : vector<8x128xf32>
    %138 = vector.extract_strided_slice %118 {offsets = [0, 256], sizes = [8, 128], strides = [1, 1]} : vector<8x384xf32> to vector<8x128xf32>
    %139 = vector.extract_strided_slice %121 {offsets = [0, 256], sizes = [8, 128], strides = [1, 1]} : vector<8x384xf32> to vector<8x128xf32>
    %140 = arith.mulf %129, %139 : vector<8x128xf32>
    %141 = arith.addf %138, %140 : vector<8x128xf32>
    %142 = math.tanh %141 : vector<8x128xf32>
    %cst_36 = arith.constant 1.000000e+00 : f32
    %143 = vector.broadcast %cst_36 : f32 to vector<8x128xf32>
    %144 = arith.subf %143, %137 : vector<8x128xf32>
    %145 = arith.mulf %144, %142 : vector<8x128xf32>
    %146 = arith.mulf %137, %112 : vector<8x128xf32>
    %147 = arith.addf %145, %146 : vector<8x128xf32>
    %148 = arith.index_cast %116 : i32 to index
    %c0_37 = arith.constant 0 : index
    %149 = vector.load %arg9[%148, %c0_37] : memref<64x128xf32, #tpu.memory_space<vmem>>, vector<8x128xf32>
    tpu.vector_store %arg9[%148, %c0_37], %147 {strides = array<i32>} : memref<64x128xf32, #tpu.memory_space<vmem>>, vector<8x128xf32>,
    %c4_i32 = arith.constant 4 : i32
    %c8_i32_38 = arith.constant 8 : i32
    %150 = arith.muli %c4_i32, %c8_i32_38 : i32
    %151 = tpu.assume_multiple %150, 8 : i32
    %152 = arith.index_cast %151 : i32 to index
    %c0_39 = arith.constant 0 : index
    %153 = vector.load %arg8[%152, %c0_39] : memref<64x384xf32, #tpu.memory_space<vmem>>, vector<8x384xf32>
    %cst_40 = arith.constant dense<0.000000e+00> : vector<8x384xf32>
    %154 = tpu.matmul %147, %7, %cst_40 {dimension_numbers = #tpu.dot_dimension_numbers<[1], [0], [0], [1], [0, 0, 1, 1], [], []>} : vector<8x128xf32>, vector<128x384xf32>, vector<8x384xf32> -> vector<8x384xf32>
    %155 = vector.broadcast %8 : vector<1x384xf32> to vector<8x384xf32>
    %156 = arith.addf %154, %155 : vector<8x384xf32>
    %157 = vector.extract_strided_slice %153 {offsets = [0, 0], sizes = [8, 128], strides = [1, 1]} : vector<8x384xf32> to vector<8x128xf32>
    %158 = vector.extract_strided_slice %156 {offsets = [0, 0], sizes = [8, 128], strides = [1, 1]} : vector<8x384xf32> to vector<8x128xf32>
    %159 = arith.addf %157, %158 : vector<8x128xf32>
    %160 = arith.negf %159 : vector<8x128xf32>
    %161 = math.exp %160 : vector<8x128xf32>
    %cst_41 = arith.constant 1.000000e+00 : f32
    %162 = vector.broadcast %cst_41 : f32 to vector<8x128xf32>
    %163 = arith.addf %162, %161 : vector<8x128xf32>
    %164 = arith.divf %162, %163 : vector<8x128xf32>
    %165 = vector.extract_strided_slice %153 {offsets = [0, 128], sizes = [8, 128], strides = [1, 1]} : vector<8x384xf32> to vector<8x128xf32>
    %166 = vector.extract_strided_slice %156 {offsets = [0, 128], sizes = [8, 128], strides = [1, 1]} : vector<8x384xf32> to vector<8x128xf32>
    %167 = arith.addf %165, %166 : vector<8x128xf32>
    %168 = arith.negf %167 : vector<8x128xf32>
    %169 = math.exp %168 : vector<8x128xf32>
    %cst_42 = arith.constant 1.000000e+00 : f32
    %170 = vector.broadcast %cst_42 : f32 to vector<8x128xf32>
    %171 = arith.addf %170, %169 : vector<8x128xf32>
    %172 = arith.divf %170, %171 : vector<8x128xf32>
    %173 = vector.extract_strided_slice %153 {offsets = [0, 256], sizes = [8, 128], strides = [1, 1]} : vector<8x384xf32> to vector<8x128xf32>
    %174 = vector.extract_strided_slice %156 {offsets = [0, 256], sizes = [8, 128], strides = [1, 1]} : vector<8x384xf32> to vector<8x128xf32>
    %175 = arith.mulf %164, %174 : vector<8x128xf32>
    %176 = arith.addf %173, %175 : vector<8x128xf32>
    %177 = math.tanh %176 : vector<8x128xf32>
    %cst_43 = arith.constant 1.000000e+00 : f32
    %178 = vector.broadcast %cst_43 : f32 to vector<8x128xf32>
    %179 = arith.subf %178, %172 : vector<8x128xf32>
    %180 = arith.mulf %179, %177 : vector<8x128xf32>
    %181 = arith.mulf %172, %147 : vector<8x128xf32>
    %182 = arith.addf %180, %181 : vector<8x128xf32>
    %183 = arith.index_cast %151 : i32 to index
    %c0_44 = arith.constant 0 : index
    %184 = vector.load %arg9[%183, %c0_44] : memref<64x128xf32, #tpu.memory_space<vmem>>, vector<8x128xf32>
    tpu.vector_store %arg9[%183, %c0_44], %182 {strides = array<i32>} : memref<64x128xf32, #tpu.memory_space<vmem>>, vector<8x128xf32>,
    %c5_i32 = arith.constant 5 : i32
    %c8_i32_45 = arith.constant 8 : i32
    %185 = arith.muli %c5_i32, %c8_i32_45 : i32
    %186 = tpu.assume_multiple %185, 8 : i32
    %187 = arith.index_cast %186 : i32 to index
    %c0_46 = arith.constant 0 : index
    %188 = vector.load %arg8[%187, %c0_46] : memref<64x384xf32, #tpu.memory_space<vmem>>, vector<8x384xf32>
    %cst_47 = arith.constant dense<0.000000e+00> : vector<8x384xf32>
    %189 = tpu.matmul %182, %7, %cst_47 {dimension_numbers = #tpu.dot_dimension_numbers<[1], [0], [0], [1], [0, 0, 1, 1], [], []>} : vector<8x128xf32>, vector<128x384xf32>, vector<8x384xf32> -> vector<8x384xf32>
    %190 = vector.broadcast %8 : vector<1x384xf32> to vector<8x384xf32>
    %191 = arith.addf %189, %190 : vector<8x384xf32>
    %192 = vector.extract_strided_slice %188 {offsets = [0, 0], sizes = [8, 128], strides = [1, 1]} : vector<8x384xf32> to vector<8x128xf32>
    %193 = vector.extract_strided_slice %191 {offsets = [0, 0], sizes = [8, 128], strides = [1, 1]} : vector<8x384xf32> to vector<8x128xf32>
    %194 = arith.addf %192, %193 : vector<8x128xf32>
    %195 = arith.negf %194 : vector<8x128xf32>
    %196 = math.exp %195 : vector<8x128xf32>
    %cst_48 = arith.constant 1.000000e+00 : f32
    %197 = vector.broadcast %cst_48 : f32 to vector<8x128xf32>
    %198 = arith.addf %197, %196 : vector<8x128xf32>
    %199 = arith.divf %197, %198 : vector<8x128xf32>
    %200 = vector.extract_strided_slice %188 {offsets = [0, 128], sizes = [8, 128], strides = [1, 1]} : vector<8x384xf32> to vector<8x128xf32>
    %201 = vector.extract_strided_slice %191 {offsets = [0, 128], sizes = [8, 128], strides = [1, 1]} : vector<8x384xf32> to vector<8x128xf32>
    %202 = arith.addf %200, %201 : vector<8x128xf32>
    %203 = arith.negf %202 : vector<8x128xf32>
    %204 = math.exp %203 : vector<8x128xf32>
    %cst_49 = arith.constant 1.000000e+00 : f32
    %205 = vector.broadcast %cst_49 : f32 to vector<8x128xf32>
    %206 = arith.addf %205, %204 : vector<8x128xf32>
    %207 = arith.divf %205, %206 : vector<8x128xf32>
    %208 = vector.extract_strided_slice %188 {offsets = [0, 256], sizes = [8, 128], strides = [1, 1]} : vector<8x384xf32> to vector<8x128xf32>
    %209 = vector.extract_strided_slice %191 {offsets = [0, 256], sizes = [8, 128], strides = [1, 1]} : vector<8x384xf32> to vector<8x128xf32>
    %210 = arith.mulf %199, %209 : vector<8x128xf32>
    %211 = arith.addf %208, %210 : vector<8x128xf32>
    %212 = math.tanh %211 : vector<8x128xf32>
    %cst_50 = arith.constant 1.000000e+00 : f32
    %213 = vector.broadcast %cst_50 : f32 to vector<8x128xf32>
    %214 = arith.subf %213, %207 : vector<8x128xf32>
    %215 = arith.mulf %214, %212 : vector<8x128xf32>
    %216 = arith.mulf %207, %182 : vector<8x128xf32>
    %217 = arith.addf %215, %216 : vector<8x128xf32>
    %218 = arith.index_cast %186 : i32 to index
    %c0_51 = arith.constant 0 : index
    %219 = vector.load %arg9[%218, %c0_51] : memref<64x128xf32, #tpu.memory_space<vmem>>, vector<8x128xf32>
    tpu.vector_store %arg9[%218, %c0_51], %217 {strides = array<i32>} : memref<64x128xf32, #tpu.memory_space<vmem>>, vector<8x128xf32>,
    %c6_i32 = arith.constant 6 : i32
    %c8_i32_52 = arith.constant 8 : i32
    %220 = arith.muli %c6_i32, %c8_i32_52 : i32
    %221 = tpu.assume_multiple %220, 8 : i32
    %222 = arith.index_cast %221 : i32 to index
    %c0_53 = arith.constant 0 : index
    %223 = vector.load %arg8[%222, %c0_53] : memref<64x384xf32, #tpu.memory_space<vmem>>, vector<8x384xf32>
    %cst_54 = arith.constant dense<0.000000e+00> : vector<8x384xf32>
    %224 = tpu.matmul %217, %7, %cst_54 {dimension_numbers = #tpu.dot_dimension_numbers<[1], [0], [0], [1], [0, 0, 1, 1], [], []>} : vector<8x128xf32>, vector<128x384xf32>, vector<8x384xf32> -> vector<8x384xf32>
    %225 = vector.broadcast %8 : vector<1x384xf32> to vector<8x384xf32>
    %226 = arith.addf %224, %225 : vector<8x384xf32>
    %227 = vector.extract_strided_slice %223 {offsets = [0, 0], sizes = [8, 128], strides = [1, 1]} : vector<8x384xf32> to vector<8x128xf32>
    %228 = vector.extract_strided_slice %226 {offsets = [0, 0], sizes = [8, 128], strides = [1, 1]} : vector<8x384xf32> to vector<8x128xf32>
    %229 = arith.addf %227, %228 : vector<8x128xf32>
    %230 = arith.negf %229 : vector<8x128xf32>
    %231 = math.exp %230 : vector<8x128xf32>
    %cst_55 = arith.constant 1.000000e+00 : f32
    %232 = vector.broadcast %cst_55 : f32 to vector<8x128xf32>
    %233 = arith.addf %232, %231 : vector<8x128xf32>
    %234 = arith.divf %232, %233 : vector<8x128xf32>
    %235 = vector.extract_strided_slice %223 {offsets = [0, 128], sizes = [8, 128], strides = [1, 1]} : vector<8x384xf32> to vector<8x128xf32>
    %236 = vector.extract_strided_slice %226 {offsets = [0, 128], sizes = [8, 128], strides = [1, 1]} : vector<8x384xf32> to vector<8x128xf32>
    %237 = arith.addf %235, %236 : vector<8x128xf32>
    %238 = arith.negf %237 : vector<8x128xf32>
    %239 = math.exp %238 : vector<8x128xf32>
    %cst_56 = arith.constant 1.000000e+00 : f32
    %240 = vector.broadcast %cst_56 : f32 to vector<8x128xf32>
    %241 = arith.addf %240, %239 : vector<8x128xf32>
    %242 = arith.divf %240, %241 : vector<8x128xf32>
    %243 = vector.extract_strided_slice %223 {offsets = [0, 256], sizes = [8, 128], strides = [1, 1]} : vector<8x384xf32> to vector<8x128xf32>
    %244 = vector.extract_strided_slice %226 {offsets = [0, 256], sizes = [8, 128], strides = [1, 1]} : vector<8x384xf32> to vector<8x128xf32>
    %245 = arith.mulf %234, %244 : vector<8x128xf32>
    %246 = arith.addf %243, %245 : vector<8x128xf32>
    %247 = math.tanh %246 : vector<8x128xf32>
    %cst_57 = arith.constant 1.000000e+00 : f32
    %248 = vector.broadcast %cst_57 : f32 to vector<8x128xf32>
    %249 = arith.subf %248, %242 : vector<8x128xf32>
    %250 = arith.mulf %249, %247 : vector<8x128xf32>
    %251 = arith.mulf %242, %217 : vector<8x128xf32>
    %252 = arith.addf %250, %251 : vector<8x128xf32>
    %253 = arith.index_cast %221 : i32 to index
    %c0_58 = arith.constant 0 : index
    %254 = vector.load %arg9[%253, %c0_58] : memref<64x128xf32, #tpu.memory_space<vmem>>, vector<8x128xf32>
    tpu.vector_store %arg9[%253, %c0_58], %252 {strides = array<i32>} : memref<64x128xf32, #tpu.memory_space<vmem>>, vector<8x128xf32>,
    %c7_i32 = arith.constant 7 : i32
    %c8_i32_59 = arith.constant 8 : i32
    %255 = arith.muli %c7_i32, %c8_i32_59 : i32
    %256 = tpu.assume_multiple %255, 8 : i32
    %257 = arith.index_cast %256 : i32 to index
    %c0_60 = arith.constant 0 : index
    %258 = vector.load %arg8[%257, %c0_60] : memref<64x384xf32, #tpu.memory_space<vmem>>, vector<8x384xf32>
    %cst_61 = arith.constant dense<0.000000e+00> : vector<8x384xf32>
    %259 = tpu.matmul %252, %7, %cst_61 {dimension_numbers = #tpu.dot_dimension_numbers<[1], [0], [0], [1], [0, 0, 1, 1], [], []>} : vector<8x128xf32>, vector<128x384xf32>, vector<8x384xf32> -> vector<8x384xf32>
    %260 = vector.broadcast %8 : vector<1x384xf32> to vector<8x384xf32>
    %261 = arith.addf %259, %260 : vector<8x384xf32>
    %262 = vector.extract_strided_slice %258 {offsets = [0, 0], sizes = [8, 128], strides = [1, 1]} : vector<8x384xf32> to vector<8x128xf32>
    %263 = vector.extract_strided_slice %261 {offsets = [0, 0], sizes = [8, 128], strides = [1, 1]} : vector<8x384xf32> to vector<8x128xf32>
    %264 = arith.addf %262, %263 : vector<8x128xf32>
    %265 = arith.negf %264 : vector<8x128xf32>
    %266 = math.exp %265 : vector<8x128xf32>
    %cst_62 = arith.constant 1.000000e+00 : f32
    %267 = vector.broadcast %cst_62 : f32 to vector<8x128xf32>
    %268 = arith.addf %267, %266 : vector<8x128xf32>
    %269 = arith.divf %267, %268 : vector<8x128xf32>
    %270 = vector.extract_strided_slice %258 {offsets = [0, 128], sizes = [8, 128], strides = [1, 1]} : vector<8x384xf32> to vector<8x128xf32>
    %271 = vector.extract_strided_slice %261 {offsets = [0, 128], sizes = [8, 128], strides = [1, 1]} : vector<8x384xf32> to vector<8x128xf32>
    %272 = arith.addf %270, %271 : vector<8x128xf32>
    %273 = arith.negf %272 : vector<8x128xf32>
    %274 = math.exp %273 : vector<8x128xf32>
    %cst_63 = arith.constant 1.000000e+00 : f32
    %275 = vector.broadcast %cst_63 : f32 to vector<8x128xf32>
    %276 = arith.addf %275, %274 : vector<8x128xf32>
    %277 = arith.divf %275, %276 : vector<8x128xf32>
    %278 = vector.extract_strided_slice %258 {offsets = [0, 256], sizes = [8, 128], strides = [1, 1]} : vector<8x384xf32> to vector<8x128xf32>
    %279 = vector.extract_strided_slice %261 {offsets = [0, 256], sizes = [8, 128], strides = [1, 1]} : vector<8x384xf32> to vector<8x128xf32>
    %280 = arith.mulf %269, %279 : vector<8x128xf32>
    %281 = arith.addf %278, %280 : vector<8x128xf32>
    %282 = math.tanh %281 : vector<8x128xf32>
    %cst_64 = arith.constant 1.000000e+00 : f32
    %283 = vector.broadcast %cst_64 : f32 to vector<8x128xf32>
    %284 = arith.subf %283, %277 : vector<8x128xf32>
    %285 = arith.mulf %284, %282 : vector<8x128xf32>
    %286 = arith.mulf %277, %252 : vector<8x128xf32>
    %287 = arith.addf %285, %286 : vector<8x128xf32>
    %288 = arith.index_cast %256 : i32 to index
    %c0_65 = arith.constant 0 : index
    %289 = vector.load %arg9[%288, %c0_65] : memref<64x128xf32, #tpu.memory_space<vmem>>, vector<8x128xf32>
    tpu.vector_store %arg9[%288, %c0_65], %287 {strides = array<i32>} : memref<64x128xf32, #tpu.memory_space<vmem>>, vector<8x128xf32>,
    %c8_i32_66 = arith.constant 8 : i32
    %c0_67 = arith.constant 0 : index
    %c0_68 = arith.constant 0 : index
    %290 = vector.load %arg9[%c0_67, %c0_68] : memref<64x128xf32, #tpu.memory_space<vmem>>, vector<64x128xf32>
    %c0_69 = arith.constant 0 : index
    %c0_70 = arith.constant 0 : index
    %291 = vector.load %arg5[%c0_69, %c0_70] : memref<128x128xf32, #tpu.memory_space<vmem>>, vector<128x128xf32>
    %cst_71 = arith.constant dense<0.000000e+00> : vector<64x128xf32>
    %292 = tpu.matmul %290, %291, %cst_71 {dimension_numbers = #tpu.dot_dimension_numbers<[1], [0], [0], [1], [0, 0, 1, 1], [], []>} : vector<64x128xf32>, vector<128x128xf32>, vector<64x128xf32> -> vector<64x128xf32>
    %c0_72 = arith.constant 0 : index
    %c0_73 = arith.constant 0 : index
    %293 = vector.load %arg6[%c0_72, %c0_73] : memref<1x128xf32, #tpu.memory_space<vmem>>, vector<1x128xf32>
    %294 = vector.broadcast %293 : vector<1x128xf32> to vector<64x128xf32>
    %295 = arith.addf %292, %294 : vector<64x128xf32>
    %c0_74 = arith.constant 0 : index
    %c0_75 = arith.constant 0 : index
    %296 = vector.load %arg7[%c0_74, %c0_75] : memref<64x128xf32, #tpu.memory_space<vmem>>, vector<64x128xf32>
    tpu.vector_store %arg7[%c0_74, %c0_75], %295 {strides = array<i32>} : memref<64x128xf32, #tpu.memory_space<vmem>>, vector<64x128xf32>,
    return
  }
  func.func @transform_0(%arg0: i32) -> (i32, i32) {
    %c0_i32 = arith.constant 0 : i32
    %c0_i32_0 = arith.constant 0 : i32
    %c0_i32_1 = arith.constant 0 : i32
    return %c0_i32, %c0_i32_0 : i32, i32
  }
  func.func @transform_1(%arg0: i32) -> (i32, i32) {
    %c0_i32 = arith.constant 0 : i32
    %c0_i32_0 = arith.constant 0 : i32
    %c0_i32_1 = arith.constant 0 : i32
    return %c0_i32, %c0_i32_0 : i32, i32
  }
  func.func @transform_2(%arg0: i32) -> (i32, i32) {
    %c0_i32 = arith.constant 0 : i32
    %c0_i32_0 = arith.constant 0 : i32
    %c0_i32_1 = arith.constant 0 : i32
    return %c0_i32, %c0_i32_0 : i32, i32
  }
  func.func @transform_3(%arg0: i32) -> (i32, i32) {
    %c0_i32 = arith.constant 0 : i32
    %c0_i32_0 = arith.constant 0 : i32
    %c0_i32_1 = arith.constant 0 : i32
    return %c0_i32, %c0_i32_0 : i32, i32
  }
  func.func @transform_4(%arg0: i32) -> (i32, i32) {
    %c0_i32 = arith.constant 0 : i32
    %c0_i32_0 = arith.constant 0 : i32
    %c0_i32_1 = arith.constant 0 : i32
    return %c0_i32, %c0_i32_0 : i32, i32
  }
  func.func @transform_5(%arg0: i32) -> (i32, i32) {
    %c0_i32 = arith.constant 0 : i32
    %c0_i32_0 = arith.constant 0 : i32
    %c0_i32_1 = arith.constant 0 : i32
    return %c0_i32, %c0_i32_0 : i32, i32
  }
  func.func @transform_6(%arg0: i32) -> (i32, i32) {
    %c0_i32 = arith.constant 0 : i32
    %c0_i32_0 = arith.constant 0 : i32
    %c0_i32_1 = arith.constant 0 : i32
    return %c0_i32, %c0_i32_0 : i32, i32
  }
}

</mosaic_0001>

<bundles_post_ra>
// kernel: tpu_custom_call.1
= control target key start
LH: loop header
LB: loop body
LE: loop exit
PB: predicated region body
PF: predicated region fallthrough
CT: control target
= control target key end

     0   :  { %11 = vsyncpa [#allocation5], 0  ;;  %s2499_s0 = inlined_call_operand.vmem [shape: f32[64,4], index: 0, kind: input, shape index: {}]   ;;  %s2500_s1 = inlined_call_operand.vmem [shape: f32[4,384], index: 1, kind: input, shape index: {}]   ;;  %s2501_s2 = inlined_call_operand.hbm [shape: f32[128,384], index: 2, kind: input, shape index: {}]   ;;  %s2502_s3 = inlined_call_operand.vmem [shape: f32[2,384], index: 3, kind: input, shape index: {}]   ;;  %s2503_s4 = inlined_call_operand.hbm [shape: f32[128,128], index: 4, kind: input, shape index: {}]   ;;  %s2504_s5 = inlined_call_operand.vmem [shape: f32[1,128], index: 5, kind: input, shape index: {}]   ;;  %s2505_s6 = inlined_call_operand.hbm [shape: f32[64,128], index: 6, kind: output, shape index: {}]  }
   0x1   :  { %12 = vsyncpa [#allocation8], 0 }
   0x2   :  { %13 = vsyncpa [#allocation6], 0  ;;  %s22_s23 = sshll.u32 %s2501_s2, 4  ;;  %s1601_s24 = smov [#allocation4]   ;;  %s23_s23 = int_to_ptr.hbm [resolvable:$true] %s22_s23 }
   0x3   :  { %s24_s25 = sshll.u32 %s1601_s24, 4  ;;  %s37_s28 = sshll.u32 %s2503_s4, 4  ;;  %s25_s25 = int_to_ptr.vmem [resolvable:$true] %s24_s25  ;;  %s38_s28 = int_to_ptr.hbm [resolvable:$true] %s37_s28 }
   0x4   :  { %s1602_s29 = smov 384   ;;  %s1603_s30 = smov 24  }
   0x5   :  { %30 = dma.hbm_to_vmem [thread:$0]  %s23_s23, 6144, %s25_s25, [#allocation5], %s1602_s29, %s1602_s29, %s1603_s30  }
   0x6   :  { %s1604_s7 = smov [#allocation7]   ;;  %s1605_s9 = smov 128  }
   0x7   :  { %s39_s8 = sshll.u32 %s1604_s7, 4  ;;  %s1606_s10 = smov 8   ;;  %s40_s8 = int_to_ptr.vmem [resolvable:$true] %s39_s8 }
   0x8   :  { %45 = dma.hbm_to_vmem [thread:$0]  %s38_s28, 2048, %s40_s8, [#allocation8], %s1605_s9, %s1605_s9, %s1606_s10  }
   0x9   :  { %1595 = dma.done.wait [#allocation5], 6144  }
   0xa   :  { %1596 = vsyncadd [#allocation5], 4294961152 }
   0xb   :  { %1597 = dma.done.wait [#allocation8], 2048  }
   0xc   :  { %1598 = vsyncadd [#allocation8], 4294965248  ;;  %v65_v0 = vld [vmem:[%s2500_s1 + $0x8] sm:$0xf]  ;;  %v64_v1 = vld [vmem:[%s2500_s1] sm:$0xff]  ;;  %vm107_vm0 = vcmask 1043456  }
   0xd   :  { %78 = vst [vmem:[#allocation1 + $0x10] ss:$2 sm:$0xff] %v65_v0  ;;  %v1662_v2 = vld [vmem:[%s2499_s0 + $0x20] sm:$0xff]  ;;  %vm82_vm1 = vcmask 31744   ;;  %v1664_v4 = vld [vmem:[#allocation4 + $0x168] sm:$0xff]  ;;  %v1677_v8 = vld [vmem:[#allocation4 + $0x150] sm:$0xff] }
   0xe   :  { %76 = vst [vmem:[#allocation1] ss:$2 sm:$0xff] %v64_v1  ;;  %v1669_v5 = vld [vmem:[%s2499_s0] sm:$0xff]  ;;  %v1683_v9 = vld [vmem:[#allocation4 + $0x160] sm:$0xff]  ;;  %v1688_v11 = vld [vmem:[#allocation4 + $0x170] sm:$0xff]  ;;  %v1607_v56 = vmov 0.0  }
   0xf   :  { %v1672_v7 = vld [vmem:[#allocation4 + $0x178] sm:$0xff]  ;;  %v1693_v12 = vld [vmem:[#allocation4 + $0x148] sm:$0xff]  ;;  %v1696_v13 = vld [vmem:[#allocation4 + $0x120] sm:$0xff]  ;;  %s1320_s4 = sshll.u32 %s2505_s6, 4  ;;  %s1321_s4 = int_to_ptr.hbm [resolvable:$true] %s1320_s4 }
  0x10   :  { %v1685_v10 = vld [vmem:[#allocation4 + $0x138] sm:$0xff]  ;;  %v1705_v15 = vld [vmem:[%s2499_s0 + $0x28] sm:$0xff]  ;;  %v1707_v16 = vld [vmem:[#allocation4 + $0x108] sm:$0xff] }
  0x11   :  { %v1699_v14 = vld [vmem:[#allocation4 + $0x158] sm:$0xff]  ;;  %v1713_v17 = vld [vmem:[%s2499_s0 + $0x8] sm:$0xff]  ;;  %v1718_v19 = vld [vmem:[#allocation4 + $0x130] sm:$0xff] }
  0x12   :  { %v1716_v18 = vld [vmem:[#allocation4 + $0x140] sm:$0xff]  ;;  %v1724_v20 = vld [vmem:[#allocation4 + $0xf0] sm:$0xff]  ;;  %v1730_v21 = vld [vmem:[#allocation4 + $0x128] sm:$0xff] }
  0x13   :  { %v1732_v22 = vld [vmem:[#allocation4 + $0xd8] sm:$0xff]  ;;  %v1739_v24 = vld [vmem:[#allocation4 + $0xc0] sm:$0xff]  ;;  %v1741_v25 = vld [vmem:[#allocation4 + $0x110] sm:$0xff] }
  0x14   :  { %v81_v3 = vld.sshfl [vmem:[#allocation1 + $0x10] sm:$0xff pattern:$0x75316420]  ;;  %v1734_v23 = vld [vmem:[#allocation4 + $0x118] sm:$0xff]  ;;  %v1759_v29 = vld [vmem:[#allocation4 + $0x100] sm:$0xff] }
  0x15   :  { %1385 = vmatpush.msk.msra.mxu3 %vm107_vm0, %v81_v3  ;;  %v79_v6 = vld.sshfl [vmem:[#allocation1] sm:$0xff pattern:$0x75316420]  ;;  %1359 = vmatpush.msk.msra.mxu2 %vm107_vm0, %v81_v3  ;;  %v1749_v26 = vld [vmem:[%s2499_s0 + $0x30] sm:$0xff]  ;;  %v1767_v31 = vld [vmem:[#allocation4 + $0x90] sm:$0xff] }
  0x16   :  { %1364 = vmatmul.msk.f32.vlgmr.msra.gmra.mxu3 %vm82_vm1, %v1662_v2  ;;  %1341 = vmatpush.msk.msra.mxu0 %vm107_vm0, %v79_v6  ;;  %v1752_v27 = vld [vmem:[#allocation4 + $0xa8] sm:$0xff]  ;;  %v1762_v30 = vld [vmem:[#allocation4 + $0xf8] sm:$0xff]  ;;  %v1773_v32 = vld [vmem:[#allocation4 + $0xe0] sm:$0xff] }
  0x17   :  { %324 = vmatpush.msrb.mxu3 %v1664_v4  ;;  %1342 = vmatmul.msk.f32.vlgmr.msra.gmra.mxu0 %vm82_vm1, %v1669_v5  ;;  %v1757_v28 = vld [vmem:[%s2499_s0 + $0x10] sm:$0xff]  ;;  %v1777_v34 = vld [vmem:[#allocation4 + $0x78] sm:$0xff]  ;;  %v1784_v36 = vld [vmem:[#allocation4 + $0xd0] sm:$0xff] }
  0x18   :  { %364 = vmatpush.msrb.mxu0 %v1672_v7  ;;  %1360 = vmatmul.msk.f32.vlgmr.msra.gmra.mxu2 %vm82_vm1, %v1669_v5  ;;  %v1775_v33 = vld [vmem:[#allocation4 + $0xe8] sm:$0xff]  ;;  %v1786_v37 = vld [vmem:[#allocation4 + $0x60] sm:$0xff]  ;;  %v1794_v38 = vld [vmem:[%s2499_s0 + $0x38] sm:$0xff] }
  0x19   :  { %325 = vmatpush.msrb.mxu3 %v1677_v8  ;;  %458 = vmatpush.msrb.mxu2 %v1688_v11  ;;  %v1782_v35 = vld [vmem:[#allocation4 + $0xc8] sm:$0xff]  ;;  %v1796_v39 = vld [vmem:[#allocation4 + $0xb0] sm:$0xff]  ;;  %v1798_v40 = vld [vmem:[#allocation4 + $0xb8] sm:$0xff] }
  0x1a   :  { %365 = vmatpush.msrb.mxu0 %v1683_v9  ;;  %v1802_v41 = vld [vmem:[#allocation4 + $0x48] sm:$0xff]  ;;  %v1807_v42 = vld [vmem:[%s2499_s0 + $0x18] sm:$0xff]  ;;  %v1812_v43 = vld [vmem:[#allocation4 + $0xa0] sm:$0xff] }
  0x1b   :  { %326 = vmatpush.msrb.mxu3 %v1685_v10  ;;  %459 = vmatpush.msrb.mxu2 %v1699_v14  ;;  %v1816_v44 = vld [vmem:[#allocation4 + $0x30] sm:$0xff]  ;;  %v1822_v45 = vld [vmem:[#allocation4 + $0x98] sm:$0xff]  ;;  %v1824_v46 = vld [vmem:[#allocation4 + $0x88] sm:$0xff] }
  0x1c   :  { %366 = vmatpush.msrb.mxu0 %v1693_v12  ;;  %2538 = vst [vmem:[#allocation13_spill] sm:$0xff] %v1816_v44  ;;  %v1826_v47 = vld [vmem:[#allocation4 + $0x18] sm:$0xff]  ;;  %v1831_v48 = vld [vmem:[#allocation4 + $0x80] sm:$0xff]  ;;  %v1833_v49 = vld [vmem:[#allocation4 + $0x70] sm:$0xff] }
  0x1d   :  { %327 = vmatpush.msrb.mxu3 %v1696_v13  ;;  %460 = vmatpush.msrb.mxu2 %v1716_v18  ;;  %2539 = vst [vmem:[#allocation14_spill] sm:$0xff] %v1826_v47  ;;  %v1835_v50 = vld [vmem:[#allocation4] sm:$0xff]  ;;  %v1840_v51 = vld [vmem:[#allocation4 + $0x68] sm:$0xff]  ;;  %v1842_v52 = vld [vmem:[#allocation4 + $0x58] sm:$0xff] }
  0x1e   :  { %1365 = vmatmul.msk.f32.gmra.mxu3 %vm82_vm1, %v1705_v15  ;;  %367 = vmatpush.msrb.mxu0 %v1718_v19  ;;  %2540 = vst [vmem:[#allocation15_spill] sm:$0xff] %v1835_v50  ;;  %v1849_v53 = vld [vmem:[#allocation4 + $0x40] sm:$0xff]  ;;  %v1851_v54 = vld [vmem:[#allocation4 + $0x28] sm:$0xff]  ;;  %v1858_v57 = vld [vmem:[#allocation4 + $0x10] sm:$0xff] }
  0x1f   :  { %328 = vmatpush.msrb.mxu3 %v1707_v16  ;;  %1343 = vmatmul.msk.f32.gmra.mxu0 %vm82_vm1, %v1713_v17  ;;  %2541 = vst [vmem:[#allocation16_spill] sm:$0xff] %v1849_v53  ;;  %v80_v55 = vld.sshfl [vmem:[#allocation1 + $0x8] sm:$0xff pattern:$0x75316420]  ;;  %v1861_v58 = vld [vmem:[#allocation4 + $0x50] sm:$0xff]  ;;  %v1867_v59 = vld [vmem:[#allocation4 + $0x38] sm:$0xff] }
  0x20   :  { %461 = vmatpush.msrb.mxu2 %v1730_v21  ;;  %368 = vmatpush.msrb.mxu0 %v1734_v23  ;;  %2542 = vst [vmem:[#allocation17_spill] sm:$0xff] %v1851_v54  ;;  %v1874_v60 = vld [vmem:[#allocation4 + $0x20] sm:$0xff]  ;;  %v1880_v61 = vld [vmem:[#allocation4 + $0x8] sm:$0xff]  ;;  %v66_v63 = vld [vmem:[%s2502_s3] ss:$2 sm:$0x7] }
  0x21   :  { %329 = vmatpush.msrb.mxu3 %v1724_v20  ;;  %1361 = vmatmul.msk.f32.gmra.mxu2 %vm82_vm1, %v1713_v17  ;;  %2543 = vst [vmem:[#allocation18_spill] sm:$0xff] %v1858_v57  ;;  %v68_v1 = vperm.slane %v66_v63, 0 }
  0x22   :  { %462 = vmatpush.msrb.mxu2 %v1741_v25  ;;  %369 = vmatpush.msrb.mxu0 %v1759_v29  ;;  %2544 = vst [vmem:[#allocation19_spill] sm:$0xff] %v1861_v58 }
  0x23   :  { %330 = vmatpush.msrb.mxu3 %v1732_v22  ;;  %1350 = vmatpush.msk.msra.mxu1 %vm107_vm0, %v80_v55  ;;  %2545 = vst [vmem:[#allocation20_spill] sm:$0xff] %v1867_v59  ;;  %v1368_v55 = vld [vmem:[%s2502_s3 + $0x1] ss:$2 sm:$0x7] }
  0x24   :  { %463 = vmatpush.msrb.mxu2 %v1762_v30  ;;  %370 = vmatpush.msrb.mxu0 %v1775_v33  ;;  %2546 = vst [vmem:[#allocation21_spill] sm:$0xff] %v1874_v60 }
  0x25   :  { %331 = vmatpush.msrb.mxu3 %v1739_v24  ;;  %1351 = vmatmul.msk.f32.vlgmr.msra.gmra.mxu1 %vm82_vm1, %v1669_v5  ;;  %2547 = vst [vmem:[#allocation22_spill] sm:$0xff] %v1880_v61 }
  0x26   :  { %1366 = vmatmul.msk.f32.gmra.mxu3 %vm82_vm1, %v1749_v26  ;;  %464 = vmatpush.msrb.mxu2 %v1773_v32 }
  0x27   :  { %332 = vmatpush.msrb.mxu3 %v1752_v27  ;;  %1344 = vmatmul.msk.f32.gmra.mxu0 %vm82_vm1, %v1757_v28 }
  0x28   :  { %371 = vmatpush.msrb.mxu0 %v1784_v36  ;;  %465 = vmatpush.msrb.mxu2 %v1782_v35 }
  0x29   :  { %333 = vmatpush.msrb.mxu3 %v1767_v31  ;;  %1362 = vmatmul.msk.f32.gmra.mxu2 %vm82_vm1, %v1757_v28 }
  0x2a   :  { %372 = vmatpush.msrb.mxu0 %v1798_v40  ;;  %466 = vmatpush.msrb.mxu2 %v1796_v39 }
  0x2b   :  { %334 = vmatpush.msrb.mxu3 %v1777_v34  ;;  %438 = vmatpush.msrb.mxu1 %v1664_v4 }
  0x2c   :  { %373 = vmatpush.msrb.mxu0 %v1812_v43  ;;  %467 = vmatpush.msrb.mxu2 %v1822_v45 }
  0x2d   :  { %335 = vmatpush.msrb.mxu3 %v1786_v37  ;;  %439 = vmatpush.msrb.mxu1 %v1677_v8 }
  0x2e   :  { %1367 = vmatmul.msk.f32.gmra.mxu3 %vm82_vm1, %v1794_v38  ;;  %374 = vmatpush.msrb.mxu0 %v1824_v46 }
  0x2f   :  { %336 = vmatpush.msrb.mxu3 %v1802_v41  ;;  %1345 = vmatmul.msk.f32.gmra.mxu0 %vm82_vm1, %v1807_v42 }
  0x30   :  { %375 = vmatpush.msrb.mxu0 %v1833_v49  ;;  %468 = vmatpush.msrb.mxu2 %v1831_v48 }
  0x31   :  { %337 = vmatpush.msrb.mxu3 %v1816_v44  ;;  %1363 = vmatmul.msk.f32.gmra.mxu2 %vm82_vm1, %v1807_v42 }
  0x32   :  { %376 = vmatpush.msrb.mxu0 %v1842_v52  ;;  %469 = vmatpush.msrb.mxu2 %v1840_v51 }
  0x33   :  { %338 = vmatpush.msrb.mxu3 %v1826_v47  ;;  %440 = vmatpush.msrb.mxu1 %v1685_v10 }
  0x34   :  { %377 = vmatpush.msrb.mxu0 %v1849_v53  ;;  %470 = vmatpush.msrb.mxu2 %v1861_v58 }
  0x35   :  { %339 = vmatpush.msrb.mxu3 %v1835_v50  ;;  %441 = vmatpush.msrb.mxu1 %v1696_v13 }
  0x36   :  { %340 = vmatmul.f32.vlgmr.msrb.gmra.mxu3 %v1607_v56  ;;  %378 = vmatpush.msrb.mxu0 %v1851_v54 }
  0x37   :  { %344 = vmatpush.msra.mxu3 %v1688_v11  ;;  %1346 = vmatmul.msk.f32.gmra.mxu0 %vm82_vm1, %v1662_v2 }
  0x38   :  { %379 = vmatpush.msrb.mxu0 %v1858_v57  ;;  %471 = vmatpush.msrb.mxu2 %v1867_v59 }
  0x39   :  { %345 = vmatpush.msra.mxu3 %v1699_v14  ;;  %1352 = vmatmul.msk.f32.gmra.mxu1 %vm82_vm1, %v1713_v17 }
  0x3a   :  { %472 = vmatpush.msrb.mxu2 %v1874_v60  ;;  %553 = vmatpush.msra.mxu0 %v1664_v4 }
  0x3b   :  { %346 = vmatpush.msra.mxu3 %v1716_v18  ;;  %442 = vmatpush.msrb.mxu1 %v1707_v16 }
  0x3c   :  { %473 = vmatpush.msrb.mxu2 %v1880_v61  ;;  %554 = vmatpush.msra.mxu0 %v1677_v8 }
  0x3d   :  { %347 = vmatpush.msra.mxu3 %v1730_v21  ;;  %443 = vmatpush.msrb.mxu1 %v1724_v20 }
  0x3e   :  { %593 = vmatpush.msra.mxu2 %v1672_v7  ;;  %555 = vmatpush.msra.mxu0 %v1685_v10 }
  0x3f   :  { %348 = vmatpush.msra.mxu3 %v1741_v25  ;;  %1347 = vmatmul.msk.f32.gmra.mxu0 %vm82_vm1, %v1705_v15 }
  0x40   :  { %594 = vmatpush.msra.mxu2 %v1683_v9  ;;  %444 = vmatpush.msrb.mxu1 %v1732_v22 }
  0x41   :  { %349 = vmatpush.msra.mxu3 %v1762_v30  ;;  %556 = vmatpush.msra.mxu0 %v1696_v13 }
  0x42   :  { %595 = vmatpush.msra.mxu2 %v1693_v12  ;;  %445 = vmatpush.msrb.mxu1 %v1739_v24 }
  0x43   :  { %350 = vmatpush.msra.mxu3 %v1773_v32  ;;  %1353 = vmatmul.msk.f32.gmra.mxu1 %vm82_vm1, %v1757_v28 }
  0x44   :  { %596 = vmatpush.msra.mxu2 %v1718_v19  ;;  %557 = vmatpush.msra.mxu0 %v1707_v16 }
  0x45   :  { %351 = vmatpush.msra.mxu3 %v1782_v35  ;;  %446 = vmatpush.msrb.mxu1 %v1752_v27 }
  0x46   :  { %597 = vmatpush.msra.mxu2 %v1734_v23  ;;  %558 = vmatpush.msra.mxu0 %v1724_v20 }
  0x47   :  { %352 = vmatpush.msra.mxu3 %v1796_v39  ;;  %1348 = vmatmul.msk.f32.gmra.mxu0 %vm82_vm1, %v1749_v26 }
  0x48   :  { %598 = vmatpush.msra.mxu2 %v1759_v29  ;;  %447 = vmatpush.msrb.mxu1 %v1767_v31 }
  0x49   :  { %353 = vmatpush.msra.mxu3 %v1822_v45  ;;  %559 = vmatpush.msra.mxu0 %v1732_v22 }
  0x4a   :  { %599 = vmatpush.msra.mxu2 %v1775_v33  ;;  %448 = vmatpush.msrb.mxu1 %v1777_v34 }
  0x4b   :  { %354 = vmatpush.msra.mxu3 %v1831_v48  ;;  %1354 = vmatmul.msk.f32.gmra.mxu1 %vm82_vm1, %v1807_v42 }
  0x4c   :  { %600 = vmatpush.msra.mxu2 %v1784_v36  ;;  %449 = vmatpush.msrb.mxu1 %v1786_v37 }
  0x4d   :  { %355 = vmatpush.msra.mxu3 %v1840_v51  ;;  %560 = vmatpush.msra.mxu0 %v1739_v24 }
  0x4e   :  { %450 = vmatpush.msrb.mxu1 %v1802_v41  ;;  %601 = vmatpush.msra.mxu2 %v1798_v40 }
  0x4f   :  { %356 = vmatpush.msra.mxu3 %v1861_v58  ;;  %1349 = vmatmul.msk.f32.gmra.mxu0 %vm82_vm1, %v1794_v38 }
  0x50   :  { %561 = vmatpush.msra.mxu0 %v1752_v27  ;;  %451 = vmatpush.msrb.mxu1 %v1816_v44 }
  0x51   :  { %357 = vmatpush.msra.mxu3 %v1867_v59  ;;  %602 = vmatpush.msra.mxu2 %v1812_v43 }
  0x52   :  { %452 = vmatpush.msrb.mxu1 %v1826_v47  ;;  %562 = vmatpush.msra.mxu0 %v1767_v31 }
  0x53   :  { %358 = vmatpush.msra.mxu3 %v1874_v60  ;;  %1355 = vmatmul.msk.f32.gmra.mxu1 %vm82_vm1, %v1662_v2 }
  0x54   :  { %453 = vmatpush.msrb.mxu1 %v1835_v50  ;;  %563 = vmatpush.msra.mxu0 %v1777_v34 }
  0x55   :  { %359 = vmatpush.msra.mxu3 %v1880_v61  ;;  %603 = vmatpush.msra.mxu2 %v1824_v46 }
  0x56   :  { %360 = vmatmul.f32.vlgmr.msra.gmra.mxu3 %v1607_v56  ;;  %573 = vmatpush.msra.mxu1 %v1688_v11 }
  0x57   :  { %478 = vmatpush.msrb.mxu3 %v1672_v7  ;;  %380 = vmatmul.f32.vlgmr.msrb.gmra.mxu0 %v1607_v56 }
  0x58   :  { %564 = vmatpush.msra.mxu0 %v1786_v37  ;;  %574 = vmatpush.msra.mxu1 %v1699_v14 }
  0x59   :  { %479 = vmatpush.msrb.mxu3 %v1683_v9  ;;  %604 = vmatpush.msra.mxu2 %v1833_v49 }
  0x5a   :  { %565 = vmatpush.msra.mxu0 %v1802_v41  ;;  %575 = vmatpush.msra.mxu1 %v1716_v18 }
  0x5b   :  { %480 = vmatpush.msrb.mxu3 %v1693_v12  ;;  %605 = vmatpush.msra.mxu2 %v1842_v52 }
  0x5c   :  { %566 = vmatpush.msra.mxu0 %v1816_v44  ;;  %576 = vmatpush.msra.mxu1 %v1730_v21 }
  0x5d   :  { %481 = vmatpush.msrb.mxu3 %v1718_v19  ;;  %1356 = vmatmul.msk.f32.gmra.mxu1 %vm82_vm1, %v1705_v15 }
  0x5e   :  { %606 = vmatpush.msra.mxu2 %v1849_v53  ;;  %577 = vmatpush.msra.mxu1 %v1741_v25 }
  0x5f   :  { %482 = vmatpush.msrb.mxu3 %v1734_v23  ;;  %567 = vmatpush.msra.mxu0 %v1826_v47 }
  0x60   :  { %607 = vmatpush.msra.mxu2 %v1851_v54  ;;  %578 = vmatpush.msra.mxu1 %v1762_v30 }
  0x61   :  { %483 = vmatpush.msrb.mxu3 %v1759_v29  ;;  %568 = vmatpush.msra.mxu0 %v1835_v50 }
  0x62   :  { %608 = vmatpush.msra.mxu2 %v1858_v57  ;;  %579 = vmatpush.msra.mxu1 %v1773_v32 }
  0x63   :  { %484 = vmatpush.msrb.mxu3 %v1775_v33  ;;  %688 = vmatpush.msrb.mxu0 %v1688_v11 }
  0x64   :  { %580 = vmatpush.msra.mxu1 %v1782_v35 }
  0x65   :  { %485 = vmatpush.msrb.mxu3 %v1784_v36  ;;  %1357 = vmatmul.msk.f32.gmra.mxu1 %vm82_vm1, %v1749_v26 }
  0x66   :  { %689 = vmatpush.msrb.mxu0 %v1699_v14  ;;  %581 = vmatpush.msra.mxu1 %v1796_v39 }
  0x67   :  { %486 = vmatpush.msrb.mxu3 %v1798_v40 }
  0x68   :  { %690 = vmatpush.msrb.mxu0 %v1716_v18  ;;  %582 = vmatpush.msra.mxu1 %v1822_v45 }
  0x69   :  { %487 = vmatpush.msrb.mxu3 %v1812_v43 }
  0x6a   :  { %691 = vmatpush.msrb.mxu0 %v1730_v21  ;;  %583 = vmatpush.msra.mxu1 %v1831_v48 }
  0x6b   :  { %488 = vmatpush.msrb.mxu3 %v1824_v46 }
  0x6c   :  { %692 = vmatpush.msrb.mxu0 %v1741_v25  ;;  %584 = vmatpush.msra.mxu1 %v1840_v51 }
  0x6d   :  { %489 = vmatpush.msrb.mxu3 %v1833_v49  ;;  %1358 = vmatmul.msk.f32.gmra.mxu1 %vm82_vm1, %v1794_v38 }
  0x6e   :  { %693 = vmatpush.msrb.mxu0 %v1762_v30  ;;  %585 = vmatpush.msra.mxu1 %v1861_v58 }
  0x6f   :  { %490 = vmatpush.msrb.mxu3 %v1842_v52 }
  0x70   :  { %694 = vmatpush.msrb.mxu0 %v1773_v32  ;;  %586 = vmatpush.msra.mxu1 %v1867_v59 }
  0x71   :  { %491 = vmatpush.msrb.mxu3 %v1849_v53 }
  0x72   :  { %695 = vmatpush.msrb.mxu0 %v1782_v35  ;;  %587 = vmatpush.msra.mxu1 %v1874_v60 }
  0x73   :  { %492 = vmatpush.msrb.mxu3 %v1851_v54 }
  0x74   :  { %696 = vmatpush.msrb.mxu0 %v1796_v39  ;;  %588 = vmatpush.msra.mxu1 %v1880_v61 }
  0x75   :  { %493 = vmatpush.msrb.mxu3 %v1858_v57 }
  0x76   :  { %697 = vmatpush.msrb.mxu0 %v1822_v45 }
  0x77   :  { %668 = vmatpush.msra.mxu3 %v1664_v4 }
  0x78   :  { %698 = vmatpush.msrb.mxu0 %v1831_v48 }
  0x79   :  { %669 = vmatpush.msra.mxu3 %v1677_v8 }
  0x7a   :  { %699 = vmatpush.msrb.mxu0 %v1840_v51 }
  0x7b   :  { %670 = vmatpush.msra.mxu3 %v1685_v10 }
  0x7c   :  { %700 = vmatpush.msrb.mxu0 %v1861_v58 }
  0x7d   :  { %671 = vmatpush.msra.mxu3 %v1696_v13 }
  0x7e   :  { %701 = vmatpush.msrb.mxu0 %v1867_v59 }
  0x7f   :  { %672 = vmatpush.msra.mxu3 %v1707_v16 }
  0x80   :  { %702 = vmatpush.msrb.mxu0 %v1874_v60  ;;  %v2057_v60 = vperm.slane %v66_v63, 1 }
  0x81   :  { %673 = vmatpush.msra.mxu3 %v1724_v20 }
  0x82   :  { %703 = vmatpush.msrb.mxu0 %v1880_v61  ;;  %2560 = vst [vmem:[#allocation35_spill] sm:$0xff] %v2057_v60 }
  0x83   :  { %674 = vmatpush.msra.mxu3 %v1732_v22 }
  0x85   :  { %675 = vmatpush.msra.mxu3 %v1739_v24 }
  0x87   :  { %676 = vmatpush.msra.mxu3 %v1752_v27 }
  0x89   :  { %677 = vmatpush.msra.mxu3 %v1767_v31 }
  0x8b   :  { %678 = vmatpush.msra.mxu3 %v1777_v34 }
  0x8d   :  { %679 = vmatpush.msra.mxu3 %v1786_v37 }
  0x8f   :  { %680 = vmatpush.msra.mxu3 %v1802_v41 }
  0x91   :  { %681 = vmatpush.msra.mxu3 %v1816_v44 }
  0x93   :  { %682 = vmatpush.msra.mxu3 %v1826_v47 }
  0x94   :  { %v131_v62 = vpop.f32.mrf.mxu0 }
  0x95   :  { %683 = vmatpush.msra.mxu3 %v1835_v50 }
  0x99   :  { %v2029_v0 = vpop.f32.mrf.mxu3 }
  0x9a   :  { %2548 = vst [vmem:[#allocation23_spill] sm:$0xff] %v2029_v0  ;;  %v132_v0 = vadd.f32 %v131_v62, %v68_v1 }
  0x9c   :  { %v134_v2 = vpop.f32.mrf.mxu0 }
  0x9d   :  { %v2031_v3 = vadd.f32 %v134_v2, %v68_v1  ;;  %v2048_v2 = vperm.slane %v1368_v55, 0 }
  0x9f   :  { %2549 = vst [vmem:[#allocation24_spill] sm:$0xff] %v2031_v3 }
  0xa0   :  { %2556 = vst [vmem:[#allocation31_spill] sm:$0xff] %v2048_v2 }
  0xa1   :  { %v2033_v5 = vpop.f32.mrf.mxu3 }
  0xa2   :  { %2550 = vst [vmem:[#allocation25_spill] sm:$0xff] %v2033_v5  ;;  %v172_v62 = vpop.f32.mrf.mxu1 }
  0xa4   :  { %v137_v6 = vpop.f32.mrf.mxu0 }
  0xa5   :  { %v2035_v15 = vadd.f32 %v137_v6, %v68_v1 }
  0xa7   :  { %2551 = vst [vmem:[#allocation26_spill] sm:$0xff] %v2035_v15 }
  0xa9   :  { %v2037_v17 = vpop.f32.mrf.mxu3 }
  0xaa   :  { %2552 = vst [vmem:[#allocation27_spill] sm:$0xff] %v2037_v17 }
  0xac   :  { %v140_v26 = vpop.f32.mrf.mxu0 }
  0xad   :  { %v2039_v28 = vadd.f32 %v140_v26, %v68_v1 }
  0xaf   :  { %2553 = vst [vmem:[#allocation28_spill] sm:$0xff] %v2039_v28 }
  0xb1   :  { %v2041_v38 = vpop.f32.mrf.mxu3 }
  0xb2   :  { %2554 = vst [vmem:[#allocation29_spill] sm:$0xff] %v2041_v38 }
  0xb4   :  { %v143_v42 = vpop.f32.mrf.mxu0 }
  0xb5   :  { %v2046_v56 = vadd.f32 %v143_v42, %v68_v1 }
  0xb7   :  { %2555 = vst [vmem:[#allocation30_spill] sm:$0xff] %v2046_v56 }
  0xb9   :  { %v341_v5 = vpop.f32.mrf.mxu3 }
  0xba   :  { %v342_v6 = vadd.f32 %v341_v5, %v2048_v2  ;;  %v2059_v5 = vperm.slane %v1368_v55, 1 }
  0xbc   :  { %v146_v15 = vpop.f32.mrf.mxu0  ;;  %v384_v17 = vadd.f32 %v342_v6, %v132_v0  ;;  %2561 = vst [vmem:[#allocation36_spill] sm:$0xff] %v2059_v5 }
  0xbd   :  { %v2051_v3 = vadd.f32 %v146_v15, %v68_v1  ;;  %v173_v15 = vadd.f32 %v172_v62, %v2057_v60 }
  0xbe   :  { %v1369_v26 = vmul.f32 -1.442695, %v384_v17 }
  0xbf   :  { %2557 = vst [vmem:[#allocation32_spill] sm:$0xff] %v2051_v3 }
  0xc0   :  { %1395 = vpow2.f32 %v1369_v26 }
  0xc4   :  { %v149_v38 = vpop.f32.mrf.mxu0 }
  0xc5   :  { %v2053_v28 = vadd.f32 %v149_v38, %v68_v1 }
  0xc6   :  { %v1396_v61 = vpop.eup %1395 }
  0xc7   :  { %2558 = vst [vmem:[#allocation33_spill] sm:$0xff] %v2053_v28  ;;  %v388_v50 = vadd.f32 1.0, %v1396_v61 }
  0xc9   :  { %1397 = vrcp.f32 %v388_v50  ;;  %vm394_vm3 = vweird.f32 %v388_v50 }
  0xcc   :  { %v152_v57 = vpop.f32.mrf.mxu0 }
  0xcd   :  { %v2055_v42 = vadd.f32 %v152_v57, %v68_v1  ;;  %v400_v57 = vand.u32 2147483648, %v388_v50  ;;  %v2063_v1 = vperm.slane %v1368_v55, 2 }
  0xcf   :  { %2559 = vst [vmem:[#allocation34_spill] sm:$0xff] %v2055_v42  ;;  %v1398_v56 = vpop.eup %1397  ;;  %v398_v42 = vand.u32 2147483647, %v388_v50  ;;  %v401_v60 = vor.u32 1.1754944e-38, %v400_v57 }
  0xd0   :  { %v390_v0 = vmul.f32 %v1398_v56, %v388_v50  ;;  %vm395_vm2 = vweird.f32 %v1398_v56 }
  0xd1   :  { %vm396_vm4 = vmor %vm394_vm3, %vm395_vm2  ;;  %vm399_vm5 = vcmp.eq.f32.partialorder %v398_v42, 8.507059e+37 }
  0xd2   :  { %v391_v38 = vsub.f32 1.0, %v390_v0 }
  0xd4   :  { %v392_v61 = vmul.f32 %v1398_v56, %v391_v38  ;;  %v381_v47 = vpop.f32.mrf.mxu0 }
  0xd5   :  { %v382_v0 = vadd.f32 %v381_v47, %v2063_v1 }
  0xd6   :  { %v393_v3 = vadd.f32 %v1398_v56, %v392_v61 }
  0xd8   :  { %v397_v62 = vsel %vm396_vm4, %v1398_v56, %v393_v3 }
  0xd9   :  { %v361_v17 = vpop.f32.mrf.mxu3 }
  0xda   :  { %v362_v6 = vadd.f32 %v361_v17, %v2059_v5  ;;  %v213_v17 = vpop.f32.mrf.mxu2 }
  0xdc   :  { %v404_v26 = vadd.f32 %v362_v6, %v173_v15  ;;  %v402_v15 = vsel %vm399_vm5, %v401_v60, %v397_v62 }
  0xdd   :  { %v424_v6 = vmul.f32 %v402_v15, %v382_v0  ;;  %v2566_v15 = vld [vmem:[#allocation21_spill] sm:$0xff] }
  0xde   :  { %v1370_v28 = vmul.f32 -1.442695, %v404_v26 }
  0xe0   :  { %1399 = vpow2.f32 %v1370_v28  ;;  %v2066_v28 = vperm.slane %v66_v63, 2 }
  0xe2   :  { %v214_v55 = vadd.f32 %v213_v17, %v2066_v28  ;;  %v2567_v17 = vld [vmem:[#allocation18_spill] sm:$0xff] }
  0xe4   :  { %v425_v50 = vadd.f32 %v424_v6, %v214_v55  ;;  %v2568_v6 = vld [vmem:[#allocation15_spill] sm:$0xff]  ;;  %v2569_v55 = vld [vmem:[#allocation22_spill] sm:$0xff] }
  0xe6   :  { %v1400_v2 = vpop.eup %1399 }
  0xe7   :  { %v408_v54 = vadd.f32 1.0, %v1400_v2 }
  0xe9   :  { %1401 = vrcp.f32 %v408_v54  ;;  %v420_v5 = vand.u32 2147483648, %v408_v54  ;;  %v418_v3 = vand.u32 2147483647, %v408_v54  ;;  %vm414_vm7 = vweird.f32 %v408_v54 }
  0xea   :  { %1403 = vtanh.f32 %v425_v50 }
  0xeb   :  { %v421_v47 = vor.u32 1.1754944e-38, %v420_v5  ;;  %vm419_vm9 = vcmp.eq.f32.partialorder %v418_v3, 8.507059e+37  ;;  %v2565_v5 = vld [vmem:[#allocation14_spill] sm:$0xff] }
  0xef   :  { %v1402_v38 = vpop.eup %1401 }
  0xf0   :  { %v410_v26 = vmul.f32 %v1402_v38, %v408_v54  ;;  %vm415_vm6 = vweird.f32 %v1402_v38  ;;  %v1404_v42 = vpop.eup %1403  ;;  %v2563_v54 = vld [vmem:[#allocation20_spill] sm:$0xff] }
  0xf1   :  { %vm416_vm8 = vmor %vm414_vm7, %vm415_vm6 }
  0xf2   :  { %v411_v61 = vsub.f32 1.0, %v410_v26 }
  0xf4   :  { %v412_v59 = vmul.f32 %v1402_v38, %v411_v61 }
  0xf6   :  { %v413_v56 = vadd.f32 %v1402_v38, %v412_v59  ;;  %v2564_v59 = vld [vmem:[#allocation17_spill] sm:$0xff] }
  0xf8   :  { %v417_v60 = vsel %vm416_vm8, %v1402_v38, %v413_v56  ;;  %v175_v38 = vpop.f32.mrf.mxu1  ;;  %v216_v56 = vpop.f32.mrf.mxu2 }
  0xf9   :  { %v422_v63 = vsel %vm419_vm9, %v421_v47, %v417_v60 }
  0xfa   :  { %v427_v2 = vsub.f32 1.0, %v422_v63  ;;  %v429_v62 = vmul.f32 0.0, %v422_v63 }
  0xfc   :  { %v428_v57 = vmul.f32 %v1404_v42, %v427_v2 }
  0xfe   :  { %v2069_v0 = vadd.f32 %v429_v62, %v428_v57  ;;  %v2578_v57 = vld [vmem:[#allocation31_spill] sm:$0xff] }
 0x100   :  { %2562 = vst [vmem:[#allocation37_spill] sm:$0xff] %v2069_v0  ;;  %454 = vmatmul.f32.vlgmr.msrb.gmra.mxu1 %v2069_v0  ;;  %474 = vmatmul.f32.vlgmr.msrb.gmra.mxu2 %v2069_v0  ;;  %v2122_v26 = vpop.f32.mrf.mxu1  ;;  %v2132_v60 = vpop.f32.mrf.mxu2 }
 0x101   :  { %494 = vmatmul.f32.vlgmr.msrb.gmra.mxu3 %v2069_v0  ;;  %708 = vmatpush.msrb.mxu1 %v1672_v7  ;;  %2570 = vst [vmem:[#allocation38_spill] sm:$0xff] %v2122_v26 }
 0x102   :  { %783 = vmatpush.msrb.mxu2 %v1664_v4  ;;  %803 = vmatpush.msrb.mxu3 %v1688_v11  ;;  %2575 = vst [vmem:[#allocation43_spill] sm:$0xff] %v2132_v60 }
 0x103   :  { %709 = vmatpush.msrb.mxu1 %v1683_v9 }
 0x104   :  { %784 = vmatpush.msrb.mxu2 %v1677_v8  ;;  %804 = vmatpush.msrb.mxu3 %v1699_v14 }
 0x105   :  { %710 = vmatpush.msrb.mxu1 %v1693_v12 }
 0x106   :  { %785 = vmatpush.msrb.mxu2 %v1685_v10  ;;  %805 = vmatpush.msrb.mxu3 %v1716_v18 }
 0x107   :  { %711 = vmatpush.msrb.mxu1 %v1718_v19 }
 0x108   :  { %786 = vmatpush.msrb.mxu2 %v1696_v13  ;;  %806 = vmatpush.msrb.mxu3 %v1730_v21  ;;  %v2124_v50 = vpop.f32.mrf.mxu1  ;;  %v2136_v2 = vpop.f32.mrf.mxu2 }
 0x109   :  { %712 = vmatpush.msrb.mxu1 %v1734_v23  ;;  %2571 = vst [vmem:[#allocation39_spill] sm:$0xff] %v2124_v50 }
 0x10a   :  { %787 = vmatpush.msrb.mxu2 %v1707_v16  ;;  %807 = vmatpush.msrb.mxu3 %v1741_v25  ;;  %2577 = vst [vmem:[#allocation45_spill] sm:$0xff] %v2136_v2 }
 0x10b   :  { %713 = vmatpush.msrb.mxu1 %v1759_v29 }
 0x10c   :  { %788 = vmatpush.msrb.mxu2 %v1724_v20  ;;  %808 = vmatpush.msrb.mxu3 %v1762_v30 }
 0x10d   :  { %714 = vmatpush.msrb.mxu1 %v1775_v33 }
 0x10e   :  { %789 = vmatpush.msrb.mxu2 %v1732_v22  ;;  %809 = vmatpush.msrb.mxu3 %v1773_v32 }
 0x10f   :  { %715 = vmatpush.msrb.mxu1 %v1784_v36 }
 0x110   :  { %790 = vmatpush.msrb.mxu2 %v1739_v24  ;;  %810 = vmatpush.msrb.mxu3 %v1782_v35  ;;  %v2126_v61 = vpop.f32.mrf.mxu1 }
 0x111   :  { %716 = vmatpush.msrb.mxu1 %v1798_v40  ;;  %2572 = vst [vmem:[#allocation40_spill] sm:$0xff] %v2126_v61 }
 0x112   :  { %791 = vmatpush.msrb.mxu2 %v1752_v27  ;;  %811 = vmatpush.msrb.mxu3 %v1796_v39 }
 0x113   :  { %717 = vmatpush.msrb.mxu1 %v1812_v43 }
 0x114   :  { %792 = vmatpush.msrb.mxu2 %v1767_v31  ;;  %812 = vmatpush.msrb.mxu3 %v1822_v45 }
 0x115   :  { %718 = vmatpush.msrb.mxu1 %v1824_v46 }
 0x116   :  { %793 = vmatpush.msrb.mxu2 %v1777_v34  ;;  %813 = vmatpush.msrb.mxu3 %v1831_v48 }
 0x117   :  { %719 = vmatpush.msrb.mxu1 %v1833_v49 }
 0x118   :  { %794 = vmatpush.msrb.mxu2 %v1786_v37  ;;  %814 = vmatpush.msrb.mxu3 %v1840_v51  ;;  %v2128_v3 = vpop.f32.mrf.mxu1 }
 0x119   :  { %720 = vmatpush.msrb.mxu1 %v1842_v52  ;;  %2573 = vst [vmem:[#allocation41_spill] sm:$0xff] %v2128_v3  ;;  %v2581_v3 = vld [vmem:[#allocation36_spill] sm:$0xff] }
 0x11a   :  { %795 = vmatpush.msrb.mxu2 %v1802_v41  ;;  %815 = vmatpush.msrb.mxu3 %v1861_v58 }
 0x11b   :  { %721 = vmatpush.msrb.mxu1 %v1849_v53 }
 0x11c   :  { %796 = vmatpush.msrb.mxu2 %v1816_v44  ;;  %816 = vmatpush.msrb.mxu3 %v2563_v54 }
 0x11d   :  { %722 = vmatpush.msrb.mxu1 %v2564_v59 }
 0x11e   :  { %797 = vmatpush.msrb.mxu2 %v2565_v5  ;;  %817 = vmatpush.msrb.mxu3 %v2566_v15 }
 0x11f   :  { %723 = vmatpush.msrb.mxu1 %v2567_v17  ;;  %v2580_v17 = vld [vmem:[#allocation35_spill] sm:$0xff] }
 0x120   :  { %798 = vmatpush.msrb.mxu2 %v2568_v6  ;;  %818 = vmatpush.msrb.mxu3 %v2569_v55  ;;  %v2130_v47 = vpop.f32.mrf.mxu1  ;;  %v2579_v55 = vld [vmem:[#allocation24_spill] sm:$0xff]  ;;  %v176_v61 = vadd.f32 %v175_v38, %v2580_v17 }
 0x121   :  { %2574 = vst [vmem:[#allocation42_spill] sm:$0xff] %v2130_v47 }
 0x128   :  { %v2134_v63 = vpop.f32.mrf.mxu1 }
 0x129   :  { %2576 = vst [vmem:[#allocation44_spill] sm:$0xff] %v2134_v63 }
 0x17d   :  { %v455_v42 = vpop.f32.mrf.mxu1 }
 0x17e   :  { %v456_v62 = vadd.f32 %v455_v42, %v2578_v57 }
 0x180   :  { %v498_v26 = vadd.f32 %v456_v62, %v2579_v55 }
 0x182   :  { %v1371_v6 = vmul.f32 -1.442695, %v498_v26 }
 0x183   :  { %v475_v50 = vpop.f32.mrf.mxu2 }
 0x184   :  { %1405 = vpow2.f32 %v1371_v6  ;;  %v476_v15 = vadd.f32 %v475_v50, %v2581_v3  ;;  %v495_v6 = vpop.f32.mrf.mxu3 }
 0x186   :  { %v518_v5 = vadd.f32 %v476_v15, %v176_v61 }
 0x188   :  { %v1372_v47 = vmul.f32 -1.442695, %v518_v5 }
 0x18a   :  { %v1406_v59 = vpop.eup %1405  ;;  %1407 = vpow2.f32 %v1372_v47  ;;  %v217_v47 = vadd.f32 %v216_v56, %v2066_v28 }
 0x18b   :  { %v502_v60 = vadd.f32 1.0, %v1406_v59  ;;  %v496_v59 = vadd.f32 %v495_v6, %v2063_v1 }
 0x18d   :  { %1409 = vrcp.f32 %v502_v60  ;;  %v514_v55 = vand.u32 2147483648, %v502_v60  ;;  %v512_v62 = vand.u32 2147483647, %v502_v60  ;;  %vm508_vm11 = vweird.f32 %v502_v60 }
 0x18f   :  { %v515_v5 = vor.u32 1.1754944e-38, %v514_v55  ;;  %vm513_vm13 = vcmp.eq.f32.partialorder %v512_v62, 8.507059e+37 }
 0x190   :  { %v1408_v63 = vpop.eup %1407 }
 0x191   :  { %v522_v2 = vadd.f32 1.0, %v1408_v63 }
 0x193   :  { %v1410_v54 = vpop.eup %1409  ;;  %1411 = vrcp.f32 %v522_v2  ;;  %v532_v44 = vand.u32 2147483647, %v522_v2  ;;  %vm528_vm15 = vweird.f32 %v522_v2 }
 0x194   :  { %v504_v42 = vmul.f32 %v1410_v54, %v502_v60  ;;  %vm509_vm10 = vweird.f32 %v1410_v54 }
 0x195   :  { %vm510_vm12 = vmor %vm508_vm11, %vm509_vm10  ;;  %vm533_vm1 = vcmp.eq.f32.partialorder %v532_v44, 8.507059e+37 }
 0x196   :  { %v505_v57 = vsub.f32 1.0, %v504_v42 }
 0x198   :  { %v506_v26 = vmul.f32 %v1410_v54, %v505_v57  ;;  %v534_v57 = vand.u32 2147483648, %v522_v2 }
 0x199   :  { %v1412_v38 = vpop.eup %1411 }
 0x19a   :  { %v524_v17 = vmul.f32 %v1412_v38, %v522_v2  ;;  %v507_v50 = vadd.f32 %v1410_v54, %v506_v26  ;;  %vm529_vm14 = vweird.f32 %v1412_v38  ;;  %v535_v60 = vor.u32 1.1754944e-38, %v534_v57 }
 0x19b   :  { %vm530_vm0 = vmor %vm528_vm15, %vm529_vm14 }
 0x19c   :  { %v525_v15 = vsub.f32 1.0, %v524_v17  ;;  %v511_v61 = vsel %vm510_vm12, %v1410_v54, %v507_v50 }
 0x19d   :  { %v516_v63 = vsel %vm513_vm13, %v515_v5, %v511_v61  ;;  %v2598_v5 = vld [vmem:[#allocation43_spill] sm:$0xff] }
 0x19e   :  { %v526_v42 = vmul.f32 %v1412_v38, %v525_v15  ;;  %v538_v3 = vmul.f32 %v516_v63, %v496_v59  ;;  %v220_v15 = vadd.f32 %v2598_v5, %v2066_v28  ;;  %v2323_v5 = vld [vmem:[#allocation4 + $0x48] sm:$0xff] }
 0x1a0   :  { %v527_v53 = vadd.f32 %v1412_v38, %v526_v42  ;;  %v539_v58 = vadd.f32 %v538_v3, %v217_v47 }
 0x1a2   :  { %v531_v26 = vsel %vm530_vm0, %v1412_v38, %v527_v53  ;;  %1413 = vtanh.f32 %v539_v58 }
 0x1a3   :  { %v536_v17 = vsel %vm533_vm1, %v535_v60, %v531_v26 }
 0x1a4   :  { %v541_v55 = vsub.f32 1.0, %v536_v17  ;;  %v543_v56 = vmul.f32 %v536_v17, %v2069_v0 }
 0x1a8   :  { %v1414_v54 = vpop.eup %1413 }
 0x1a9   :  { %v542_v62 = vmul.f32 %v1414_v54, %v541_v55 }
 0x1ab   :  { %v2145_v6 = vadd.f32 %v543_v56, %v542_v62  ;;  %v2212_v56 = vld [vmem:[#allocation4 + $0x178] sm:$0xff] }
 0x1ad   :  { %2582 = vst [vmem:[#allocation24_spill] sm:$0xff] %v2145_v6  ;;  %569 = vmatmul.f32.vlgmr.msra.gmra.mxu0 %v2145_v6  ;;  %589 = vmatmul.f32.vlgmr.msra.gmra.mxu1 %v2145_v6 }
 0x1ae   :  { %609 = vmatmul.f32.vlgmr.msra.gmra.mxu2 %v2145_v6  ;;  %823 = vmatpush.msra.mxu0 %v1672_v7  ;;  %v2584_v7 = vld [vmem:[#allocation16_spill] sm:$0xff] }
 0x1af   :  { %898 = vmatpush.msra.mxu1 %v1664_v4  ;;  %918 = vmatpush.msra.mxu2 %v1688_v11  ;;  %v2583_v4 = vld [vmem:[#allocation19_spill] sm:$0xff]  ;;  %v2588_v11 = vld [vmem:[#allocation14_spill] sm:$0xff] }
 0x1b0   :  { %824 = vmatpush.msra.mxu0 %v1683_v9  ;;  %v2586_v9 = vld [vmem:[#allocation20_spill] sm:$0xff] }
 0x1b1   :  { %899 = vmatpush.msra.mxu1 %v1677_v8  ;;  %919 = vmatpush.msra.mxu2 %v1699_v14  ;;  %v2585_v8 = vld [vmem:[#allocation13_spill] sm:$0xff]  ;;  %v2591_v14 = vld [vmem:[#allocation15_spill] sm:$0xff] }
 0x1b2   :  { %825 = vmatpush.msra.mxu0 %v1693_v12  ;;  %v2589_v12 = vld [vmem:[#allocation21_spill] sm:$0xff] }
 0x1b3   :  { %900 = vmatpush.msra.mxu1 %v1685_v10  ;;  %920 = vmatpush.msra.mxu2 %v1716_v18  ;;  %v2587_v10 = vld [vmem:[#allocation17_spill] sm:$0xff] }
 0x1b4   :  { %826 = vmatpush.msra.mxu0 %v1718_v19 }
 0x1b5   :  { %901 = vmatpush.msra.mxu1 %v1696_v13  ;;  %921 = vmatpush.msra.mxu2 %v1730_v21  ;;  %v2590_v13 = vld [vmem:[#allocation18_spill] sm:$0xff] }
 0x1b6   :  { %827 = vmatpush.msra.mxu0 %v1734_v23  ;;  %v2594_v21 = vld [vmem:[#allocation38_spill] sm:$0xff]  ;;  %v2595_v23 = vld [vmem:[#allocation31_spill] sm:$0xff] }
 0x1b7   :  { %902 = vmatpush.msra.mxu1 %v1707_v16  ;;  %922 = vmatpush.msra.mxu2 %v1741_v25  ;;  %v2592_v16 = vld [vmem:[#allocation22_spill] sm:$0xff]  ;;  %v2596_v25 = vld [vmem:[#allocation36_spill] sm:$0xff] }
 0x1b8   :  { %828 = vmatpush.msra.mxu0 %v1759_v29  ;;  %v2597_v29 = vld [vmem:[#allocation26_spill] sm:$0xff] }
 0x1b9   :  { %903 = vmatpush.msra.mxu1 %v1724_v20  ;;  %923 = vmatpush.msra.mxu2 %v1762_v30  ;;  %v2593_v20 = vld [vmem:[#allocation35_spill] sm:$0xff] }
 0x1ba   :  { %829 = vmatpush.msra.mxu0 %v1775_v33 }
 0x1bb   :  { %904 = vmatpush.msra.mxu1 %v1732_v22  ;;  %924 = vmatpush.msra.mxu2 %v1773_v32  ;;  %v179_v22 = vadd.f32 %v2594_v21, %v2593_v20  ;;  %v2233_v21 = vld [vmem:[#allocation4 + $0x138] sm:$0xff] }
 0x1bc   :  { %830 = vmatpush.msra.mxu0 %v1784_v36 }
 0x1bd   :  { %905 = vmatpush.msra.mxu1 %v1739_v24  ;;  %925 = vmatpush.msra.mxu2 %v1782_v35 }
 0x1be   :  { %831 = vmatpush.msra.mxu0 %v1798_v40 }
 0x1bf   :  { %906 = vmatpush.msra.mxu1 %v1752_v27  ;;  %926 = vmatpush.msra.mxu2 %v1796_v39 }
 0x1c0   :  { %832 = vmatpush.msra.mxu0 %v1812_v43 }
 0x1c1   :  { %907 = vmatpush.msra.mxu1 %v1767_v31  ;;  %927 = vmatpush.msra.mxu2 %v1822_v45 }
 0x1c2   :  { %833 = vmatpush.msra.mxu0 %v1824_v46 }
 0x1c3   :  { %908 = vmatpush.msra.mxu1 %v1777_v34  ;;  %928 = vmatpush.msra.mxu2 %v1831_v48 }
 0x1c4   :  { %834 = vmatpush.msra.mxu0 %v1833_v49 }
 0x1c5   :  { %909 = vmatpush.msra.mxu1 %v1786_v37  ;;  %929 = vmatpush.msra.mxu2 %v1840_v51 }
 0x1c6   :  { %835 = vmatpush.msra.mxu0 %v1842_v52 }
 0x1c7   :  { %910 = vmatpush.msra.mxu1 %v1802_v41  ;;  %930 = vmatpush.msra.mxu2 %v2583_v4 }
 0x1c8   :  { %836 = vmatpush.msra.mxu0 %v2584_v7 }
 0x1c9   :  { %911 = vmatpush.msra.mxu1 %v2585_v8  ;;  %931 = vmatpush.msra.mxu2 %v2586_v9  ;;  %v2215_v8 = vld [vmem:[#allocation4 + $0x168] sm:$0xff] }
 0x1ca   :  { %837 = vmatpush.msra.mxu0 %v2587_v10  ;;  %v2218_v10 = vld [vmem:[#allocation4 + $0x170] sm:$0xff] }
 0x1cb   :  { %912 = vmatpush.msra.mxu1 %v2588_v11  ;;  %932 = vmatpush.msra.mxu2 %v2589_v12  ;;  %v2221_v11 = vld [vmem:[#allocation4 + $0x160] sm:$0xff] }
 0x1cc   :  { %838 = vmatpush.msra.mxu0 %v2590_v13 }
 0x1cd   :  { %913 = vmatpush.msra.mxu1 %v2591_v14  ;;  %933 = vmatpush.msra.mxu2 %v2592_v16  ;;  %v2224_v14 = vld [vmem:[#allocation4 + $0x150] sm:$0xff] }
 0x22a   :  { %v570_v18 = vpop.f32.mrf.mxu0  ;;  %v590_v19 = vpop.f32.mrf.mxu1 }
 0x22b   :  { %v571_v24 = vadd.f32 %v570_v18, %v2595_v23  ;;  %v591_v27 = vadd.f32 %v590_v19, %v2596_v25  ;;  %v2227_v18 = vld [vmem:[#allocation4 + $0x158] sm:$0xff]  ;;  %v2230_v19 = vld [vmem:[#allocation4 + $0x148] sm:$0xff] }
 0x22d   :  { %v613_v30 = vadd.f32 %v571_v24, %v2597_v29  ;;  %v633_v31 = vadd.f32 %v591_v27, %v179_v22  ;;  %v2236_v22 = vld [vmem:[#allocation4 + $0x140] sm:$0xff]  ;;  %v2239_v24 = vld [vmem:[#allocation4 + $0x130] sm:$0xff]  ;;  %v2245_v29 = vld [vmem:[#allocation4 + $0x128] sm:$0xff] }
 0x22e   :  { %v2242_v27 = vld [vmem:[#allocation4 + $0x120] sm:$0xff] }
 0x22f   :  { %v1373_v32 = vmul.f32 -1.442695, %v613_v30  ;;  %v1374_v33 = vmul.f32 -1.442695, %v633_v31  ;;  %v2248_v30 = vld [vmem:[#allocation4 + $0x118] sm:$0xff]  ;;  %v2251_v31 = vld [vmem:[#allocation4 + $0x108] sm:$0xff] }
 0x231   :  { %1415 = vpow2.f32 %v1373_v32  ;;  %v610_v52 = vpop.f32.mrf.mxu2  ;;  %v2254_v32 = vld [vmem:[#allocation4 + $0x110] sm:$0xff] }
 0x232   :  { %1417 = vpow2.f32 %v1374_v33  ;;  %v611_v3 = vadd.f32 %v610_v52, %v2063_v1  ;;  %v2257_v33 = vld [vmem:[#allocation4 + $0x100] sm:$0xff]  ;;  %v2302_v52 = vld [vmem:[#allocation4 + $0x88] sm:$0xff] }
 0x237   :  { %v1416_v34 = vpop.eup %1415 }
 0x238   :  { %v1418_v35 = vpop.eup %1417  ;;  %v617_v36 = vadd.f32 1.0, %v1416_v34  ;;  %v2260_v34 = vld [vmem:[#allocation4 + $0xf0] sm:$0xff] }
 0x239   :  { %v637_v37 = vadd.f32 1.0, %v1418_v35  ;;  %v2263_v35 = vld [vmem:[#allocation4 + $0xf8] sm:$0xff] }
 0x23a   :  { %1419 = vrcp.f32 %v617_v36  ;;  %v629_v46 = vand.u32 2147483648, %v617_v36  ;;  %v627_v49 = vand.u32 2147483647, %v617_v36  ;;  %vm623_vm3 = vweird.f32 %v617_v36 }
 0x23b   :  { %1421 = vrcp.f32 %v637_v37  ;;  %v649_v59 = vand.u32 2147483648, %v637_v37  ;;  %vm643_vm7 = vweird.f32 %v637_v37  ;;  %v647_v47 = vand.u32 2147483647, %v637_v37 }
 0x23c   :  { %v630_v58 = vor.u32 1.1754944e-38, %v629_v46  ;;  %vm628_vm5 = vcmp.eq.f32.partialorder %v627_v49, 8.507059e+37  ;;  %v2290_v46 = vld [vmem:[#allocation4 + $0xb0] sm:$0xff] }
 0x23d   :  { %v650_v57 = vor.u32 1.1754944e-38, %v649_v59  ;;  %vm648_vm9 = vcmp.eq.f32.partialorder %v647_v47, 8.507059e+37  ;;  %v2296_v49 = vld [vmem:[#allocation4 + $0x90] sm:$0xff]  ;;  %v2332_v59 = vld [vmem:[#allocation4 + $0x28] sm:$0xff] }
 0x240   :  { %v1420_v39 = vpop.eup %1419 }
 0x241   :  { %v1422_v40 = vpop.eup %1421  ;;  %v619_v41 = vmul.f32 %v1420_v39, %v617_v36  ;;  %vm624_vm2 = vweird.f32 %v1420_v39  ;;  %v2266_v36 = vld [vmem:[#allocation4 + $0xe8] sm:$0xff] }
 0x242   :  { %v639_v43 = vmul.f32 %v1422_v40, %v637_v37  ;;  %vm625_vm4 = vmor %vm623_vm3, %vm624_vm2  ;;  %vm644_vm6 = vweird.f32 %v1422_v40  ;;  %v2269_v37 = vld [vmem:[#allocation4 + $0xd8] sm:$0xff] }
 0x243   :  { %v620_v44 = vsub.f32 1.0, %v619_v41  ;;  %vm645_vm8 = vmor %vm643_vm7, %vm644_vm6  ;;  %v2278_v41 = vld [vmem:[#allocation4 + $0xc0] sm:$0xff] }
 0x244   :  { %v640_v45 = vsub.f32 1.0, %v639_v43  ;;  %v2281_v43 = vld [vmem:[#allocation4 + $0xc8] sm:$0xff] }
 0x245   :  { %v621_v48 = vmul.f32 %v1420_v39, %v620_v44  ;;  %v2284_v44 = vld [vmem:[#allocation4 + $0xb8] sm:$0xff] }
 0x246   :  { %v641_v51 = vmul.f32 %v1422_v40, %v640_v45  ;;  %v2287_v45 = vld [vmem:[#allocation4 + $0xa8] sm:$0xff] }
 0x247   :  { %v622_v53 = vadd.f32 %v1420_v39, %v621_v48  ;;  %v2293_v48 = vld [vmem:[#allocation4 + $0xa0] sm:$0xff] }
 0x248   :  { %v642_v50 = vadd.f32 %v1422_v40, %v641_v51  ;;  %v2299_v51 = vld [vmem:[#allocation4 + $0x98] sm:$0xff] }
 0x249   :  { %v626_v2 = vsel %vm625_vm4, %v1420_v39, %v622_v53  ;;  %v2272_v39 = vld [vmem:[#allocation4 + $0xe0] sm:$0xff]  ;;  %v2305_v53 = vld [vmem:[#allocation4 + $0x78] sm:$0xff] }
 0x24a   :  { %v631_v38 = vsel %vm628_vm5, %v630_v58, %v626_v2  ;;  %v646_v42 = vsel %vm645_vm8, %v1422_v40, %v642_v50  ;;  %v2275_v40 = vld [vmem:[#allocation4 + $0xd0] sm:$0xff]  ;;  %v2308_v58 = vld [vmem:[#allocation4 + $0x80] sm:$0xff]  ;;  %v2320_v50 = vld [vmem:[#allocation4 + $0x58] sm:$0xff] }
 0x24b   :  { %v653_v61 = vmul.f32 %v631_v38, %v611_v3  ;;  %v651_v60 = vsel %vm648_vm9, %v650_v57, %v646_v42  ;;  %v2311_v3 = vld [vmem:[#allocation4 + $0x70] sm:$0xff]  ;;  %v2314_v2 = vld [vmem:[#allocation4 + $0x60] sm:$0xff]  ;;  %v2317_v38 = vld [vmem:[#allocation4 + $0x68] sm:$0xff] }
 0x24c   :  { %v656_v26 = vsub.f32 1.0, %v651_v60  ;;  %v658_v54 = vmul.f32 %v651_v60, %v2145_v6 }
 0x24d   :  { %v654_v63 = vadd.f32 %v653_v61, %v220_v15  ;;  %v2328_v15 = vld [vmem:[#allocation4 + $0x30] sm:$0xff]  ;;  %v2335_v61 = vld [vmem:[#allocation4 + $0x18] sm:$0xff] }
 0x24e   :  { %2599 = vst [vmem:[#allocation19_spill] sm:$0xff] %v2335_v61 }
 0x24f   :  { %1423 = vtanh.f32 %v654_v63 }
 0x255   :  { %v1424_v17 = vpop.eup %1423 }
 0x256   :  { %v657_v55 = vmul.f32 %v1424_v17, %v656_v26  ;;  %v2602_v26 = vld [vmem:[#allocation28_spill] sm:$0xff] }
 0x258   :  { %v2207_v62 = vadd.f32 %v658_v54, %v657_v55 }
 0x25a   :  { %684 = vmatmul.f32.vlgmr.msra.gmra.mxu3 %v2207_v62  ;;  %704 = vmatmul.f32.vlgmr.msrb.gmra.mxu0 %v2207_v62 }
 0x25b   :  { %724 = vmatmul.f32.vlgmr.msrb.gmra.mxu1 %v2207_v62  ;;  %938 = vmatpush.msra.mxu3 %v2212_v56 }
 0x25c   :  { %1013 = vmatpush.msrb.mxu0 %v2215_v8  ;;  %1033 = vmatpush.msrb.mxu1 %v2218_v10 }
 0x25d   :  { %939 = vmatpush.msra.mxu3 %v2221_v11 }
 0x25e   :  { %1014 = vmatpush.msrb.mxu0 %v2224_v14  ;;  %1034 = vmatpush.msrb.mxu1 %v2227_v18 }
 0x25f   :  { %940 = vmatpush.msra.mxu3 %v2230_v19 }
 0x260   :  { %1015 = vmatpush.msrb.mxu0 %v2233_v21  ;;  %1035 = vmatpush.msrb.mxu1 %v2236_v22 }
 0x261   :  { %941 = vmatpush.msra.mxu3 %v2239_v24 }
 0x262   :  { %1016 = vmatpush.msrb.mxu0 %v2242_v27  ;;  %1036 = vmatpush.msrb.mxu1 %v2245_v29 }
 0x263   :  { %942 = vmatpush.msra.mxu3 %v2248_v30 }
 0x264   :  { %1017 = vmatpush.msrb.mxu0 %v2251_v31  ;;  %1037 = vmatpush.msrb.mxu1 %v2254_v32 }
 0x265   :  { %943 = vmatpush.msra.mxu3 %v2257_v33 }
 0x266   :  { %1018 = vmatpush.msrb.mxu0 %v2260_v34  ;;  %1038 = vmatpush.msrb.mxu1 %v2263_v35 }
 0x267   :  { %944 = vmatpush.msra.mxu3 %v2266_v36 }
 0x268   :  { %1019 = vmatpush.msrb.mxu0 %v2269_v37  ;;  %1039 = vmatpush.msrb.mxu1 %v2272_v39 }
 0x269   :  { %945 = vmatpush.msra.mxu3 %v2275_v40 }
 0x26a   :  { %1020 = vmatpush.msrb.mxu0 %v2278_v41  ;;  %1040 = vmatpush.msrb.mxu1 %v2281_v43 }
 0x26b   :  { %946 = vmatpush.msra.mxu3 %v2284_v44 }
 0x26c   :  { %1021 = vmatpush.msrb.mxu0 %v2287_v45  ;;  %1041 = vmatpush.msrb.mxu1 %v2290_v46 }
 0x26d   :  { %947 = vmatpush.msra.mxu3 %v2293_v48 }
 0x26e   :  { %1022 = vmatpush.msrb.mxu0 %v2296_v49  ;;  %1042 = vmatpush.msrb.mxu1 %v2299_v51 }
 0x26f   :  { %948 = vmatpush.msra.mxu3 %v2302_v52 }
 0x270   :  { %1023 = vmatpush.msrb.mxu0 %v2305_v53  ;;  %1043 = vmatpush.msrb.mxu1 %v2308_v58 }
 0x271   :  { %949 = vmatpush.msra.mxu3 %v2311_v3 }
 0x272   :  { %1024 = vmatpush.msrb.mxu0 %v2314_v2  ;;  %1044 = vmatpush.msrb.mxu1 %v2317_v38 }
 0x273   :  { %950 = vmatpush.msra.mxu3 %v2320_v50 }
 0x274   :  { %1025 = vmatpush.msrb.mxu0 %v2323_v5  ;;  %1045 = vmatpush.msrb.mxu1 %v2583_v4  ;;  %v2340_v4 = vld [vmem:[#allocation4] sm:$0xff] }
 0x275   :  { %951 = vmatpush.msra.mxu3 %v2584_v7  ;;  %2600 = vst [vmem:[#allocation16_spill] sm:$0xff] %v2340_v4 }
 0x276   :  { %1026 = vmatpush.msrb.mxu0 %v2328_v15  ;;  %1046 = vmatpush.msrb.mxu1 %v2586_v9  ;;  %v2601_v9 = vld [vmem:[#allocation39_spill] sm:$0xff] }
 0x277   :  { %952 = vmatpush.msra.mxu3 %v2332_v59  ;;  %v182_v47 = vadd.f32 %v2601_v9, %v2593_v20 }
 0x278   :  { %1027 = vmatpush.msrb.mxu0 %v2335_v61  ;;  %1047 = vmatpush.msrb.mxu1 %v2589_v12 }
 0x279   :  { %953 = vmatpush.msra.mxu3 %v2590_v13 }
 0x27a   :  { %1028 = vmatpush.msrb.mxu0 %v2340_v4  ;;  %1048 = vmatpush.msrb.mxu1 %v2592_v16 }
 0x2d7   :  { %v705_v7 = vpop.f32.mrf.mxu0 }
 0x2d8   :  { %v706_v63 = vadd.f32 %v705_v7, %v2596_v25 }
 0x2da   :  { %v748_v42 = vadd.f32 %v706_v63, %v182_v47 }
 0x2dc   :  { %v1376_v57 = vmul.f32 -1.442695, %v748_v42 }
 0x2dd   :  { %v685_v60 = vpop.f32.mrf.mxu3 }
 0x2de   :  { %1425 = vpow2.f32 %v1376_v57  ;;  %v686_v12 = vadd.f32 %v685_v60, %v2595_v23 }
 0x2e0   :  { %v728_v13 = vadd.f32 %v686_v12, %v2602_v26  ;;  %v725_v12 = vpop.f32.mrf.mxu1 }
 0x2e2   :  { %v1375_v17 = vmul.f32 -1.442695, %v728_v13 }
 0x2e4   :  { %v1426_v55 = vpop.eup %1425  ;;  %1427 = vpow2.f32 %v1375_v17  ;;  %v726_v17 = vadd.f32 %v725_v12, %v2063_v1 }
 0x2e5   :  { %v752_v54 = vadd.f32 1.0, %v1426_v55 }
 0x2e7   :  { %1429 = vrcp.f32 %v752_v54  ;;  %v764_v4 = vand.u32 2147483648, %v752_v54  ;;  %vm758_vm15 = vweird.f32 %v752_v54  ;;  %v762_v61 = vand.u32 2147483647, %v752_v54 }
 0x2e9   :  { %vm763_vm1 = vcmp.eq.f32.partialorder %v762_v61, 8.507059e+37 }
 0x2ea   :  { %v1428_v16 = vpop.eup %1427 }
 0x2eb   :  { %v732_v6 = vadd.f32 1.0, %v1428_v16 }
 0x2ed   :  { %1431 = vrcp.f32 %v732_v6  ;;  %v1430_v0 = vpop.eup %1429  ;;  %v744_v42 = vand.u32 2147483648, %v732_v6  ;;  %v742_v60 = vand.u32 2147483647, %v732_v6  ;;  %vm738_vm11 = vweird.f32 %v732_v6 }
 0x2ee   :  { %v754_v9 = vmul.f32 %v1430_v0, %v752_v54  ;;  %vm759_vm14 = vweird.f32 %v1430_v0 }
 0x2ef   :  { %v745_v13 = vor.u32 1.1754944e-38, %v744_v42  ;;  %vm743_vm13 = vcmp.eq.f32.partialorder %v742_v60, 8.507059e+37  ;;  %vm760_vm0 = vmor %vm758_vm15, %vm759_vm14 }
 0x2f0   :  { %v755_v47 = vsub.f32 1.0, %v754_v9  ;;  %v2603_v9 = vld [vmem:[#allocation45_spill] sm:$0xff] }
 0x2f2   :  { %v756_v25 = vmul.f32 %v1430_v0, %v755_v47 }
 0x2f3   :  { %v1432_v20 = vpop.eup %1431 }
 0x2f4   :  { %v734_v7 = vmul.f32 %v1432_v20, %v732_v6  ;;  %vm739_vm10 = vweird.f32 %v1432_v20  ;;  %v757_v23 = vadd.f32 %v1430_v0, %v756_v25  ;;  %v765_v6 = vor.u32 1.1754944e-38, %v764_v4 }
 0x2f5   :  { %vm740_vm12 = vmor %vm738_vm11, %vm739_vm10 }
 0x2f6   :  { %v735_v63 = vsub.f32 1.0, %v734_v7  ;;  %v223_v7 = vadd.f32 %v2603_v9, %v2066_v28 }
 0x2f8   :  { %v736_v57 = vmul.f32 %v1432_v20, %v735_v63 }
 0x2fa   :  { %v737_v26 = vadd.f32 %v1432_v20, %v736_v57  ;;  %v761_v57 = vsel %vm760_vm0, %v1430_v0, %v757_v23  ;;  %v1517_v0 = vld [vmem:[#allocation4 + $0x50] sm:$0xff]  ;;  %v2396_v23 = vld [vmem:[#allocation4 + $0x40] sm:$0xff] }
 0x2fb   :  { %v766_v42 = vsel %vm763_vm1, %v765_v6, %v761_v57 }
 0x2fc   :  { %v741_v55 = vsel %vm740_vm12, %v1432_v20, %v737_v26  ;;  %v771_v12 = vsub.f32 1.0, %v766_v42  ;;  %v773_v26 = vmul.f32 %v766_v42, %v2207_v62 }
 0x2fd   :  { %v746_v16 = vsel %vm743_vm13, %v745_v13, %v741_v55 }
 0x2fe   :  { %v768_v63 = vmul.f32 %v746_v16, %v726_v17 }
 0x300   :  { %v769_v47 = vadd.f32 %v768_v63, %v223_v7 }
 0x302   :  { %1433 = vtanh.f32 %v769_v47 }
 0x308   :  { %v1434_v20 = vpop.eup %1433 }
 0x309   :  { %v772_v60 = vmul.f32 %v1434_v20, %v771_v12  ;;  %v2611_v20 = vld [vmem:[#allocation23_spill] sm:$0xff] }
 0x30b   :  { %v2353_v25 = vadd.f32 %v773_v26, %v772_v60  ;;  %v226_v60 = vadd.f32 %v2611_v20, %v2066_v28 }
 0x30d   :  { %799 = vmatmul.f32.vlgmr.msrb.gmra.mxu2 %v2353_v25  ;;  %819 = vmatmul.f32.vlgmr.msrb.gmra.mxu3 %v2353_v25 }
 0x30e   :  { %839 = vmatmul.f32.vlgmr.msra.gmra.mxu0 %v2353_v25  ;;  %1053 = vmatpush.msrb.mxu2 %v2212_v56 }
 0x30f   :  { %1128 = vmatpush.msrb.mxu3 %v2215_v8  ;;  %1148 = vmatpush.msra.mxu0 %v2218_v10  ;;  %v1519_v8 = vld [vmem:[#allocation4 + $0x38] sm:$0xff]  ;;  %v2604_v10 = vld [vmem:[#allocation19_spill] sm:$0xff] }
 0x310   :  { %1054 = vmatpush.msrb.mxu2 %v2221_v11 }
 0x311   :  { %1129 = vmatpush.msrb.mxu3 %v2224_v14  ;;  %1149 = vmatpush.msra.mxu0 %v2227_v18  ;;  %v1520_v14 = vld [vmem:[#allocation4 + $0x20] sm:$0xff]  ;;  %v2402_v18 = vld [vmem:[#allocation4 + $0x10] sm:$0xff] }
 0x312   :  { %1055 = vmatpush.msrb.mxu2 %v2230_v19 }
 0x313   :  { %1130 = vmatpush.msrb.mxu3 %v2233_v21  ;;  %1150 = vmatpush.msra.mxu0 %v2236_v22  ;;  %v2605_v21 = vld [vmem:[#allocation16_spill] sm:$0xff]  ;;  %v1522_v22 = vld [vmem:[#allocation4 + $0x8] sm:$0xff] }
 0x314   :  { %1056 = vmatpush.msrb.mxu2 %v2239_v24 }
 0x315   :  { %1131 = vmatpush.msrb.mxu3 %v2242_v27  ;;  %1151 = vmatpush.msra.mxu0 %v2245_v29 }
 0x316   :  { %1057 = vmatpush.msrb.mxu2 %v2248_v30 }
 0x317   :  { %1132 = vmatpush.msrb.mxu3 %v2251_v31  ;;  %1152 = vmatpush.msra.mxu0 %v2254_v32  ;;  %v2606_v31 = vld [vmem:[#allocation35_spill] sm:$0xff]  ;;  %v2607_v32 = vld [vmem:[#allocation40_spill] sm:$0xff] }
 0x318   :  { %1058 = vmatpush.msrb.mxu2 %v2257_v33 }
 0x319   :  { %1133 = vmatpush.msrb.mxu3 %v2260_v34  ;;  %1153 = vmatpush.msra.mxu0 %v2263_v35  ;;  %v185_v34 = vadd.f32 %v2607_v32, %v2606_v31  ;;  %v2608_v35 = vld [vmem:[#allocation31_spill] sm:$0xff] }
 0x31a   :  { %1059 = vmatpush.msrb.mxu2 %v2266_v36 }
 0x31b   :  { %1134 = vmatpush.msrb.mxu3 %v2269_v37  ;;  %1154 = vmatpush.msra.mxu0 %v2272_v39  ;;  %v2609_v39 = vld [vmem:[#allocation36_spill] sm:$0xff] }
 0x31c   :  { %1060 = vmatpush.msrb.mxu2 %v2275_v40 }
 0x31d   :  { %1135 = vmatpush.msrb.mxu3 %v2278_v41  ;;  %1155 = vmatpush.msra.mxu0 %v2281_v43  ;;  %v2610_v43 = vld [vmem:[#allocation30_spill] sm:$0xff] }
 0x31e   :  { %1061 = vmatpush.msrb.mxu2 %v2284_v44 }
 0x31f   :  { %1136 = vmatpush.msrb.mxu3 %v2287_v45  ;;  %1156 = vmatpush.msra.mxu0 %v2290_v46 }
 0x320   :  { %1062 = vmatpush.msrb.mxu2 %v2293_v48 }
 0x321   :  { %1137 = vmatpush.msrb.mxu3 %v2296_v49  ;;  %1157 = vmatpush.msra.mxu0 %v2299_v51 }
 0x322   :  { %1063 = vmatpush.msrb.mxu2 %v2302_v52 }
 0x323   :  { %1138 = vmatpush.msrb.mxu3 %v2305_v53  ;;  %1158 = vmatpush.msra.mxu0 %v2308_v58 }
 0x324   :  { %1064 = vmatpush.msrb.mxu2 %v2311_v3 }
 0x325   :  { %1139 = vmatpush.msrb.mxu3 %v2314_v2  ;;  %1159 = vmatpush.msra.mxu0 %v2317_v38 }
 0x326   :  { %1065 = vmatpush.msrb.mxu2 %v2320_v50 }
 0x327   :  { %1140 = vmatpush.msrb.mxu3 %v2323_v5  ;;  %1160 = vmatpush.msra.mxu0 %v1517_v0 }
 0x328   :  { %1066 = vmatpush.msrb.mxu2 %v2396_v23 }
 0x329   :  { %1141 = vmatpush.msrb.mxu3 %v2328_v15  ;;  %1161 = vmatpush.msra.mxu0 %v1519_v8 }
 0x32a   :  { %1067 = vmatpush.msrb.mxu2 %v2332_v59 }
 0x32b   :  { %1142 = vmatpush.msrb.mxu3 %v2604_v10  ;;  %1162 = vmatpush.msra.mxu0 %v1520_v14 }
 0x32c   :  { %1068 = vmatpush.msrb.mxu2 %v2402_v18 }
 0x32d   :  { %1143 = vmatpush.msrb.mxu3 %v2605_v21  ;;  %1163 = vmatpush.msra.mxu0 %v1522_v22 }
 0x38b   :  { %v840_v9 = vpop.f32.mrf.mxu0 }
 0x38c   :  { %v841_v57 = vadd.f32 %v840_v9, %v2063_v1 }
 0x390   :  { %v800_v27 = vpop.f32.mrf.mxu2  ;;  %v820_v29 = vpop.f32.mrf.mxu3 }
 0x391   :  { %v801_v37 = vadd.f32 %v800_v27, %v2608_v35  ;;  %v821_v41 = vadd.f32 %v820_v29, %v2609_v39 }
 0x393   :  { %v843_v45 = vadd.f32 %v801_v37, %v2610_v43  ;;  %v863_v46 = vadd.f32 %v821_v41, %v185_v34  ;;  %v1253_v41 = vld [vmem:[#allocation7 + $0x40] sm:$0xff] }
 0x395   :  { %v1377_v49 = vmul.f32 -1.442695, %v843_v45  ;;  %v1378_v51 = vmul.f32 -1.442695, %v863_v46  ;;  %v1252_v45 = vld [vmem:[#allocation7 + $0x38] sm:$0xff] }
 0x397   :  { %1435 = vpow2.f32 %v1377_v49  ;;  %v1251_v49 = vld [vmem:[#allocation7 + $0x30] sm:$0xff] }
 0x398   :  { %1437 = vpow2.f32 %v1378_v51  ;;  %v1250_v51 = vld [vmem:[#allocation7 + $0x28] sm:$0xff] }
 0x39d   :  { %v1436_v53 = vpop.eup %1435 }
 0x39e   :  { %v1438_v58 = vpop.eup %1437  ;;  %v847_v2 = vadd.f32 1.0, %v1436_v53 }
 0x39f   :  { %v867_v38 = vadd.f32 1.0, %v1438_v58  ;;  %v1249_v58 = vld [vmem:[#allocation7 + $0x20] sm:$0xff] }
 0x3a0   :  { %1439 = vrcp.f32 %v847_v2  ;;  %v859_v13 = vand.u32 2147483648, %v847_v2  ;;  %v857_v16 = vand.u32 2147483647, %v847_v2  ;;  %vm853_vm3 = vweird.f32 %v847_v2 }
 0x3a1   :  { %1441 = vrcp.f32 %v867_v38  ;;  %v879_v0 = vand.u32 2147483648, %v867_v38  ;;  %vm873_vm7 = vweird.f32 %v867_v38  ;;  %v877_v8 = vand.u32 2147483647, %v867_v38 }
 0x3a2   :  { %v860_v47 = vor.u32 1.1754944e-38, %v859_v13  ;;  %vm858_vm5 = vcmp.eq.f32.partialorder %v857_v16, 8.507059e+37 }
 0x3a3   :  { %v880_v21 = vor.u32 1.1754944e-38, %v879_v0  ;;  %vm878_vm9 = vcmp.eq.f32.partialorder %v877_v8, 8.507059e+37 }
 0x3a6   :  { %v1440_v5 = vpop.eup %1439 }
 0x3a7   :  { %v1442_v15 = vpop.eup %1441  ;;  %v849_v61 = vmul.f32 %v1440_v5, %v847_v2  ;;  %vm854_vm2 = vweird.f32 %v1440_v5 }
 0x3a8   :  { %v869_v4 = vmul.f32 %v1442_v15, %v867_v38  ;;  %vm855_vm4 = vmor %vm853_vm3, %vm854_vm2  ;;  %vm874_vm6 = vweird.f32 %v1442_v15  ;;  %v1248_v38 = vld [vmem:[#allocation7 + $0x18] sm:$0xff] }
 0x3a9   :  { %v850_v54 = vsub.f32 1.0, %v849_v61  ;;  %vm875_vm8 = vmor %vm873_vm7, %vm874_vm6  ;;  %v1246_v61 = vld [vmem:[#allocation7 + $0x8] sm:$0xff] }
 0x3aa   :  { %v870_v17 = vsub.f32 1.0, %v869_v4 }
 0x3ab   :  { %v851_v55 = vmul.f32 %v1440_v5, %v850_v54  ;;  %v1245_v54 = vld [vmem:[#allocation7] sm:$0xff] }
 0x3ac   :  { %v871_v7 = vmul.f32 %v1442_v15, %v870_v17 }
 0x3ad   :  { %v852_v63 = vadd.f32 %v1440_v5, %v851_v55 }
 0x3ae   :  { %v872_v12 = vadd.f32 %v1442_v15, %v871_v7 }
 0x3af   :  { %v856_v6 = vsel %vm855_vm4, %v1440_v5, %v852_v63  ;;  %v1247_v5 = vld [vmem:[#allocation7 + $0x10] sm:$0xff] }
 0x3b0   :  { %v861_v42 = vsel %vm858_vm5, %v860_v47, %v856_v6  ;;  %v876_v14 = vsel %vm875_vm8, %v1442_v15, %v872_v12 }
 0x3b1   :  { %v883_v26 = vmul.f32 %v861_v42, %v841_v57  ;;  %v881_v22 = vsel %vm878_vm9, %v880_v21, %v876_v14 }
 0x3b2   :  { %v886_v27 = vsub.f32 1.0, %v881_v22  ;;  %v888_v34 = vmul.f32 %v881_v22, %v2353_v25 }
 0x3b3   :  { %v884_v10 = vadd.f32 %v883_v26, %v226_v60  ;;  %v2614_v26 = vld [vmem:[#allocation25_spill] sm:$0xff] }
 0x3b4   :  { %v229_v0 = vadd.f32 %v2614_v26, %v2066_v28 }
 0x3b5   :  { %1443 = vtanh.f32 %v884_v10 }
 0x3bb   :  { %v1444_v29 = vpop.eup %1443 }
 0x3bc   :  { %v887_v32 = vmul.f32 %v1444_v29, %v886_v27 }
 0x3be   :  { %v2415_v37 = vadd.f32 %v888_v34, %v887_v32 }
 0x3c0   :  { %914 = vmatmul.f32.vlgmr.msra.gmra.mxu1 %v2415_v37  ;;  %934 = vmatmul.f32.vlgmr.msra.gmra.mxu2 %v2415_v37 }
 0x3c1   :  { %954 = vmatmul.f32.vlgmr.msra.gmra.mxu3 %v2415_v37  ;;  %1168 = vmatpush.msra.mxu1 %v2212_v56  ;;  %v1260_v56 = vld [vmem:[#allocation7 + $0x78] sm:$0xff] }
 0x3c2   :  { %1265 = vmatpush.msra.mxu2 %v1260_v56 }
 0x3c3   :  { %1169 = vmatpush.msra.mxu1 %v2221_v11  ;;  %v1259_v11 = vld [vmem:[#allocation7 + $0x70] sm:$0xff] }
 0x3c4   :  { %1266 = vmatpush.msra.mxu2 %v1259_v11 }
 0x3c5   :  { %1170 = vmatpush.msra.mxu1 %v2230_v19  ;;  %v1258_v19 = vld [vmem:[#allocation7 + $0x68] sm:$0xff] }
 0x3c6   :  { %1267 = vmatpush.msra.mxu2 %v1258_v19 }
 0x3c7   :  { %1171 = vmatpush.msra.mxu1 %v2239_v24  ;;  %v1257_v24 = vld [vmem:[#allocation7 + $0x60] sm:$0xff] }
 0x3c8   :  { %1268 = vmatpush.msra.mxu2 %v1257_v24 }
 0x3c9   :  { %1172 = vmatpush.msra.mxu1 %v2248_v30 }
 0x3cb   :  { %1173 = vmatpush.msra.mxu1 %v2257_v33 }
 0x3cd   :  { %1174 = vmatpush.msra.mxu1 %v2266_v36  ;;  %v1256_v36 = vld [vmem:[#allocation7 + $0x58] sm:$0xff] }
 0x3ce   :  { %1269 = vmatpush.msra.mxu2 %v1256_v36  ;;  %v2615_v36 = vld [vmem:[#allocation37_spill] sm:$0xff] }
 0x3cf   :  { %1175 = vmatpush.msra.mxu1 %v2275_v40  ;;  %v2612_v40 = vld [vmem:[#allocation32_spill] sm:$0xff] }
 0x3d1   :  { %1176 = vmatpush.msra.mxu1 %v2284_v44 }
 0x3d3   :  { %1177 = vmatpush.msra.mxu1 %v2293_v48  ;;  %v1255_v48 = vld [vmem:[#allocation7 + $0x50] sm:$0xff] }
 0x3d4   :  { %1270 = vmatpush.msra.mxu2 %v1255_v48 }
 0x3d5   :  { %1178 = vmatpush.msra.mxu1 %v2302_v52 }
 0x3d7   :  { %1179 = vmatpush.msra.mxu1 %v2311_v3  ;;  %v1254_v3 = vld [vmem:[#allocation7 + $0x48] sm:$0xff] }
 0x3d8   :  { %1271 = vmatpush.msra.mxu2 %v1254_v3 }
 0x3d9   :  { %1180 = vmatpush.msra.mxu1 %v2320_v50 }
 0x3da   :  { %1272 = vmatpush.msra.mxu2 %v1253_v41 }
 0x3db   :  { %1181 = vmatpush.msra.mxu1 %v2396_v23 }
 0x3dc   :  { %1273 = vmatpush.msra.mxu2 %v1252_v45 }
 0x3dd   :  { %1182 = vmatpush.msra.mxu1 %v2332_v59  ;;  %v2613_v59 = vld [vmem:[#allocation41_spill] sm:$0xff] }
 0x3de   :  { %v188_v23 = vadd.f32 %v2613_v59, %v2606_v31  ;;  %1274 = vmatpush.msra.mxu2 %v1251_v49  ;;  %v2464_v49 = vld [vmem:[%s2504_s5] ss:$0 sm:$0xff]  ;;  %s1608_s5 = smov [#allocation9]  }
 0x3df   :  { %1183 = vmatpush.msra.mxu1 %v2402_v18  ;;  %s1318_s8 = sshll.u32 %s1608_s5, 4  ;;  %s1319_s8 = int_to_ptr.vmem [resolvable:$true] %s1318_s8 }
 0x3e0   :  { %1275 = vmatpush.msra.mxu2 %v1250_v51 }
 0x3e2   :  { %1276 = vmatpush.msra.mxu2 %v1249_v58 }
 0x3e4   :  { %1277 = vmatpush.msra.mxu2 %v1248_v38 }
 0x3e6   :  { %1278 = vmatpush.msra.mxu2 %v1247_v5 }
 0x3e8   :  { %1279 = vmatpush.msra.mxu2 %v1246_v61 }
 0x3ea   :  { %1280 = vmatpush.msra.mxu2 %v1245_v54 }
 0x43d   :  { %v915_v30 = vpop.f32.mrf.mxu1 }
 0x43e   :  { %v916_v33 = vadd.f32 %v915_v30, %v2608_v35 }
 0x440   :  { %v958_v44 = vadd.f32 %v916_v33, %v2612_v40  ;;  %v2616_v40 = vld [vmem:[#allocation24_spill] sm:$0xff] }
 0x442   :  { %v1379_v52 = vmul.f32 -1.442695, %v958_v44 }
 0x443   :  { %v935_v50 = vpop.f32.mrf.mxu2 }
 0x444   :  { %1445 = vpow2.f32 %v1379_v52  ;;  %v936_v18 = vadd.f32 %v935_v50, %v2609_v39  ;;  %v955_v47 = vpop.f32.mrf.mxu3  ;;  %v2617_v52 = vld [vmem:[#allocation42_spill] sm:$0xff] }
 0x445   :  { %v956_v20 = vadd.f32 %v955_v47, %v2063_v1  ;;  %v191_v3 = vadd.f32 %v2617_v52, %v2606_v31 }
 0x446   :  { %v978_v43 = vadd.f32 %v936_v18, %v188_v23  ;;  %v2618_v23 = vld [vmem:[#allocation33_spill] sm:$0xff] }
 0x448   :  { %v1380_v46 = vmul.f32 -1.442695, %v978_v43 }
 0x44a   :  { %v1446_v53 = vpop.eup %1445  ;;  %1447 = vpow2.f32 %v1380_v46 }
 0x44b   :  { %v962_v2 = vadd.f32 1.0, %v1446_v53 }
 0x44d   :  { %1449 = vrcp.f32 %v962_v2  ;;  %v974_v16 = vand.u32 2147483648, %v962_v2  ;;  %v972_v7 = vand.u32 2147483647, %v962_v2  ;;  %vm968_vm11 = vweird.f32 %v962_v2 }
 0x44f   :  { %v975_v42 = vor.u32 1.1754944e-38, %v974_v16  ;;  %vm973_vm13 = vcmp.eq.f32.partialorder %v972_v7, 8.507059e+37 }
 0x450   :  { %v1448_v15 = vpop.eup %1447 }
 0x451   :  { %v982_v4 = vadd.f32 1.0, %v1448_v15 }
 0x453   :  { %v1450_v13 = vpop.eup %1449  ;;  %1451 = vrcp.f32 %v982_v4  ;;  %v994_v14 = vand.u32 2147483648, %v982_v4  ;;  %v992_v22 = vand.u32 2147483647, %v982_v4  ;;  %vm988_vm15 = vweird.f32 %v982_v4 }
 0x454   :  { %v964_v17 = vmul.f32 %v1450_v13, %v962_v2  ;;  %vm969_vm10 = vweird.f32 %v1450_v13 }
 0x455   :  { %vm970_vm12 = vmor %vm968_vm11, %vm969_vm10  ;;  %v995_v32 = vor.u32 1.1754944e-38, %v994_v14  ;;  %vm993_vm1 = vcmp.eq.f32.partialorder %v992_v22, 8.507059e+37 }
 0x456   :  { %v965_v55 = vsub.f32 1.0, %v964_v17 }
 0x458   :  { %v966_v9 = vmul.f32 %v1450_v13, %v965_v55 }
 0x459   :  { %v1452_v63 = vpop.eup %1451 }
 0x45a   :  { %v984_v57 = vmul.f32 %v1452_v63, %v982_v4  ;;  %v967_v6 = vadd.f32 %v1450_v13, %v966_v9  ;;  %vm989_vm14 = vweird.f32 %v1452_v63 }
 0x45b   :  { %vm990_vm0 = vmor %vm988_vm15, %vm989_vm14 }
 0x45c   :  { %v985_v12 = vsub.f32 1.0, %v984_v57  ;;  %v971_v60 = vsel %vm970_vm12, %v1450_v13, %v967_v6 }
 0x45d   :  { %v976_v8 = vsel %vm973_vm13, %v975_v42, %v971_v60  ;;  %v2619_v60 = vld [vmem:[#allocation27_spill] sm:$0xff] }
 0x45e   :  { %v986_v10 = vmul.f32 %v1452_v63, %v985_v12  ;;  %v998_v21 = vmul.f32 %v976_v8, %v956_v20  ;;  %v232_v26 = vadd.f32 %v2619_v60, %v2066_v28 }
 0x460   :  { %v987_v27 = vadd.f32 %v1452_v63, %v986_v10  ;;  %v999_v29 = vadd.f32 %v998_v21, %v229_v0 }
 0x462   :  { %v991_v34 = vsel %vm990_vm0, %v1452_v63, %v987_v27  ;;  %1453 = vtanh.f32 %v999_v29 }
 0x463   :  { %v996_v56 = vsel %vm993_vm1, %v995_v32, %v991_v34 }
 0x464   :  { %v1001_v11 = vsub.f32 1.0, %v996_v56  ;;  %v1003_v30 = vmul.f32 %v996_v56, %v2415_v37 }
 0x468   :  { %v1454_v19 = vpop.eup %1453 }
 0x469   :  { %v1002_v24 = vmul.f32 %v1454_v19, %v1001_v11 }
 0x46b   :  { %v2445_v33 = vadd.f32 %v1003_v30, %v1002_v24 }
 0x46d   :  { %1029 = vmatmul.f32.vlgmr.msrb.gmra.mxu0 %v2445_v33  ;;  %1049 = vmatmul.f32.vlgmr.msrb.gmra.mxu1 %v2445_v33 }
 0x46e   :  { %1069 = vmatmul.f32.vlgmr.msrb.gmra.mxu2 %v2445_v33 }
 0x476   :  { %1281 = vmatmul.f32.vlgmr.msra.gmra.mxu2 %v2615_v36 }
 0x47e   :  { %1284 = vmatmul.f32.gmra.mxu2 %v2616_v40 }
 0x486   :  { %1287 = vmatmul.f32.gmra.mxu2 %v2207_v62 }
 0x48e   :  { %1290 = vmatmul.f32.gmra.mxu2 %v2353_v25 }
 0x496   :  { %1293 = vmatmul.f32.gmra.mxu2 %v2415_v37 }
 0x49e   :  { %1296 = vmatmul.f32.gmra.mxu2 %v2445_v33 }
 0x4ea   :  { %v1030_v44 = vpop.f32.mrf.mxu0  ;;  %v1050_v48 = vpop.f32.mrf.mxu1 }
 0x4eb   :  { %v1031_v50 = vadd.f32 %v1030_v44, %v2608_v35  ;;  %v1051_v59 = vadd.f32 %v1050_v48, %v2609_v39 }
 0x4ed   :  { %v1073_v18 = vadd.f32 %v1031_v50, %v2618_v23  ;;  %v1093_v41 = vadd.f32 %v1051_v59, %v191_v3 }
 0x4ef   :  { %v1381_v43 = vmul.f32 -1.442695, %v1073_v18  ;;  %v1382_v62 = vmul.f32 -1.442695, %v1093_v41 }
 0x4f1   :  { %1455 = vpow2.f32 %v1381_v43  ;;  %v1070_v25 = vpop.f32.mrf.mxu2 }
 0x4f2   :  { %1457 = vpow2.f32 %v1382_v62  ;;  %v1071_v47 = vadd.f32 %v1070_v25, %v2063_v1  ;;  %v2621_v62 = vld [vmem:[#allocation34_spill] sm:$0xff] }
 0x4f7   :  { %v1456_v37 = vpop.eup %1455 }
 0x4f8   :  { %v1458_v45 = vpop.eup %1457  ;;  %v1077_v46 = vadd.f32 1.0, %v1456_v37 }
 0x4f9   :  { %v1097_v51 = vadd.f32 1.0, %v1458_v45  ;;  %v1282_v53 = vpop.f32.mrf.mxu2 }
 0x4fa   :  { %1459 = vrcp.f32 %v1077_v46  ;;  %v1283_v58 = vadd.f32 %v2464_v49, %v1282_v53  ;;  %v1089_v17 = vand.u32 2147483648, %v1077_v46  ;;  %v1087_v16 = vand.u32 2147483647, %v1077_v46 }
 0x4fb   :  { %1461 = vrcp.f32 %v1097_v51  ;;  %vm1083_vm3 = vweird.f32 %v1077_v46  ;;  %v1109_v0 = vand.u32 2147483648, %v1097_v51  ;;  %vm1103_vm7 = vweird.f32 %v1097_v51 }
 0x4fc   :  { %1306 = vst [vmem:[#allocation9] sm:$0xff] %v1283_v58  ;;  %v1090_v63 = vor.u32 1.1754944e-38, %v1089_v17  ;;  %vm1088_vm5 = vcmp.eq.f32.partialorder %v1087_v16, 8.507059e+37  ;;  %v1107_v10 = vand.u32 2147483647, %v1097_v51 }
 0x4fd   :  { %v1110_v22 = vor.u32 1.1754944e-38, %v1109_v0 }
 0x4fe   :  { %vm1108_vm9 = vcmp.eq.f32.partialorder %v1107_v10, 8.507059e+37 }
 0x500   :  { %v1460_v2 = vpop.eup %1459 }
 0x501   :  { %v1462_v38 = vpop.eup %1461  ;;  %v1079_v5 = vmul.f32 %v1460_v2, %v1077_v46  ;;  %v1285_v15 = vpop.f32.mrf.mxu2  ;;  %vm1084_vm2 = vweird.f32 %v1460_v2 }
 0x502   :  { %v1099_v61 = vmul.f32 %v1462_v38, %v1097_v51  ;;  %v1286_v4 = vadd.f32 %v2464_v49, %v1285_v15  ;;  %vm1085_vm4 = vmor %vm1083_vm3, %vm1084_vm2  ;;  %vm1104_vm6 = vweird.f32 %v1462_v38 }
 0x503   :  { %v1080_v54 = vsub.f32 1.0, %v1079_v5  ;;  %vm1105_vm8 = vmor %vm1103_vm7, %vm1104_vm6 }
 0x504   :  { %v1100_v13 = vsub.f32 1.0, %v1099_v61  ;;  %1307 = vst [vmem:[#allocation9 + $0x8] sm:$0xff] %v1286_v4 }
 0x505   :  { %v1081_v55 = vmul.f32 %v1460_v2, %v1080_v54 }
 0x506   :  { %v1101_v9 = vmul.f32 %v1462_v38, %v1100_v13 }
 0x507   :  { %v1082_v7 = vadd.f32 %v1460_v2, %v1081_v55 }
 0x508   :  { %v1102_v12 = vadd.f32 %v1462_v38, %v1101_v9 }
 0x509   :  { %v1086_v57 = vsel %vm1085_vm4, %v1460_v2, %v1082_v7  ;;  %v1288_v6 = vpop.f32.mrf.mxu2 }
 0x50a   :  { %v1091_v42 = vsel %vm1088_vm5, %v1090_v63, %v1086_v57  ;;  %v1289_v20 = vadd.f32 %v2464_v49, %v1288_v6  ;;  %v1106_v21 = vsel %vm1105_vm8, %v1462_v38, %v1102_v12  ;;  %v2622_v63 = vld [vmem:[#allocation29_spill] sm:$0xff] }
 0x50b   :  { %v1113_v8 = vmul.f32 %v1091_v42, %v1071_v47  ;;  %v1111_v27 = vsel %vm1108_vm9, %v1110_v22, %v1106_v21  ;;  %v235_v47 = vadd.f32 %v2622_v63, %v2066_v28 }
 0x50c   :  { %1308 = vst [vmem:[#allocation9 + $0x10] sm:$0xff] %v1289_v20  ;;  %v1116_v34 = vsub.f32 1.0, %v1111_v27  ;;  %v1118_v19 = vmul.f32 %v1111_v27, %v2445_v33  ;;  %v2620_v33 = vld [vmem:[#allocation44_spill] sm:$0xff] }
 0x50d   :  { %v1114_v14 = vadd.f32 %v1113_v8, %v232_v26  ;;  %v194_v52 = vadd.f32 %v2620_v33, %v2606_v31 }
 0x50f   :  { %1463 = vtanh.f32 %v1114_v14 }
 0x511   :  { %v1291_v29 = vpop.f32.mrf.mxu2 }
 0x512   :  { %v1292_v32 = vadd.f32 %v2464_v49, %v1291_v29 }
 0x514   :  { %1309 = vst [vmem:[#allocation9 + $0x18] sm:$0xff] %v1292_v32 }
 0x515   :  { %v1464_v56 = vpop.eup %1463 }
 0x516   :  { %v1117_v11 = vmul.f32 %v1464_v56, %v1116_v34 }
 0x518   :  { %v2474_v24 = vadd.f32 %v1118_v19, %v1117_v11 }
 0x519   :  { %v1294_v30 = vpop.f32.mrf.mxu2 }
 0x51a   :  { %v1295_v36 = vadd.f32 %v2464_v49, %v1294_v30  ;;  %1144 = vmatmul.f32.vlgmr.msrb.gmra.mxu3 %v2474_v24  ;;  %1164 = vmatmul.f32.vlgmr.msra.gmra.mxu0 %v2474_v24 }
 0x51b   :  { %1184 = vmatmul.f32.vlgmr.msra.gmra.mxu1 %v2474_v24  ;;  %1299 = vmatmul.f32.gmra.mxu2 %v2474_v24 }
 0x51c   :  { %1310 = vst [vmem:[#allocation9 + $0x20] sm:$0xff] %v1295_v36 }
 0x521   :  { %v1297_v40 = vpop.f32.mrf.mxu2 }
 0x522   :  { %v1298_v44 = vadd.f32 %v2464_v49, %v1297_v40 }
 0x524   :  { %1311 = vst [vmem:[#allocation9 + $0x28] sm:$0xff] %v1298_v44 }
 0x597   :  { %v1165_v48 = vpop.f32.mrf.mxu0 }
 0x598   :  { %v1166_v3 = vadd.f32 %v1165_v48, %v2609_v39  ;;  %v1185_v4 = vpop.f32.mrf.mxu1 }
 0x599   :  { %v1186_v55 = vadd.f32 %v1185_v4, %v2063_v1 }
 0x59a   :  { %v1208_v50 = vadd.f32 %v1166_v3, %v194_v52 }
 0x59c   :  { %v1384_v59 = vmul.f32 -1.442695, %v1208_v50 }
 0x59d   :  { %v1145_v23 = vpop.f32.mrf.mxu3 }
 0x59e   :  { %1465 = vpow2.f32 %v1384_v59  ;;  %v1146_v18 = vadd.f32 %v1145_v23, %v2608_v35  ;;  %v1300_v41 = vpop.f32.mrf.mxu2 }
 0x59f   :  { %v1301_v43 = vadd.f32 %v2464_v49, %v1300_v41 }
 0x5a0   :  { %v1188_v25 = vadd.f32 %v1146_v18, %v2621_v62 }
 0x5a1   :  { %1312 = vst [vmem:[#allocation9 + $0x30] sm:$0xff] %v1301_v43 }
 0x5a2   :  { %v1383_v37 = vmul.f32 -1.442695, %v1188_v25 }
 0x5a4   :  { %v1466_v45 = vpop.eup %1465  ;;  %1467 = vpow2.f32 %v1383_v37 }
 0x5a5   :  { %v1212_v46 = vadd.f32 1.0, %v1466_v45 }
 0x5a7   :  { %1469 = vrcp.f32 %v1212_v46  ;;  %v1224_v57 = vand.u32 2147483648, %v1212_v46  ;;  %vm1218_vm15 = vweird.f32 %v1212_v46  ;;  %v1222_v42 = vand.u32 2147483647, %v1212_v46 }
 0x5a9   :  { %v1225_v60 = vor.u32 1.1754944e-38, %v1224_v57  ;;  %vm1223_vm1 = vcmp.eq.f32.partialorder %v1222_v42, 8.507059e+37 }
 0x5aa   :  { %v1468_v31 = vpop.eup %1467 }
 0x5ab   :  { %v1192_v51 = vadd.f32 1.0, %v1468_v31 }
 0x5ad   :  { %1471 = vrcp.f32 %v1192_v51  ;;  %v1470_v39 = vpop.eup %1469  ;;  %v1204_v5 = vand.u32 2147483648, %v1192_v51  ;;  %v1202_v61 = vand.u32 2147483647, %v1192_v51  ;;  %vm1198_vm11 = vweird.f32 %v1192_v51 }
 0x5ae   :  { %v1214_v53 = vmul.f32 %v1470_v39, %v1212_v46  ;;  %vm1219_vm14 = vweird.f32 %v1470_v39 }
 0x5af   :  { %v1205_v17 = vor.u32 1.1754944e-38, %v1204_v5  ;;  %vm1203_vm13 = vcmp.eq.f32.partialorder %v1202_v61, 8.507059e+37  ;;  %vm1220_vm0 = vmor %vm1218_vm15, %vm1219_vm14 }
 0x5b0   :  { %v1215_v38 = vsub.f32 1.0, %v1214_v53 }
 0x5b2   :  { %v1216_v54 = vmul.f32 %v1470_v39, %v1215_v38 }
 0x5b3   :  { %v1472_v58 = vpop.eup %1471 }
 0x5b4   :  { %v1194_v2 = vmul.f32 %v1472_v58, %v1192_v51  ;;  %vm1199_vm10 = vweird.f32 %v1472_v58  ;;  %v1217_v7 = vadd.f32 %v1470_v39, %v1216_v54 }
 0x5b5   :  { %vm1200_vm12 = vmor %vm1198_vm11, %vm1199_vm10 }
 0x5b6   :  { %v1195_v35 = vsub.f32 1.0, %v1194_v2  ;;  %v1221_v20 = vsel %vm1220_vm0, %v1470_v39, %v1217_v7 }
 0x5b7   :  { %v1226_v26 = vsel %vm1223_vm1, %v1225_v60, %v1221_v20 }
 0x5b8   :  { %v1196_v15 = vmul.f32 %v1472_v58, %v1195_v35  ;;  %v1231_v1 = vsub.f32 1.0, %v1226_v26  ;;  %v1233_v10 = vmul.f32 %v1226_v26, %v2474_v24 }
 0x5ba   :  { %v1197_v13 = vadd.f32 %v1472_v58, %v1196_v15 }
 0x5bc   :  { %v1201_v16 = vsel %vm1200_vm12, %v1472_v58, %v1197_v13 }
 0x5bd   :  { %v1206_v9 = vsel %vm1203_vm13, %v1205_v17, %v1201_v16 }
 0x5be   :  { %v1228_v6 = vmul.f32 %v1206_v9, %v1186_v55 }
 0x5c0   :  { %v1229_v12 = vadd.f32 %v1228_v6, %v235_v47 }
 0x5c2   :  { %1473 = vtanh.f32 %v1229_v12 }
 0x5c8   :  { %v1474_v0 = vpop.eup %1473 }
 0x5c9   :  { %v1232_v8 = vmul.f32 %v1474_v0, %v1231_v1 }
 0x5cb   :  { %v1234_v14 = vadd.f32 %v1233_v10, %v1232_v8 }
 0x5cd   :  { %1302 = vmatmul.f32.gmra.mxu2 %v1234_v14 }
 0x650   :  { %v1303_v28 = vpop.f32.mrf.mxu2 }
 0x651   :  { %v1304_v21 = vadd.f32 %v2464_v49, %v1303_v28 }
 0x653   :  { %1313 = vst [vmem:[#allocation9 + $0x38] sm:$0xff] %v1304_v21 }
 0x654   :  { %1326 = dma.vmem_to_hbm [thread:$0]  %s1319_s8, 1024, %s1321_s4, [#allocation6], %s1605_s9, %s1605_s9, %s1606_s10  }
 0x655   :  { %1599 = dma.done.wait [#allocation6], 1024  }
 0x656   :  { %1600 = vsyncadd [#allocation6], 4294966272 }
 0x657   :  { %1331 = vsyncpa [#allocation5], 1 }
 0x658   :  { %1332 = vsyncpa [#allocation8], 1 }
 0x659   :  { %1333 = vsyncpa [#allocation6], 1 }

</bundles_post_ra>
